<compile_context>
chip_gen: v7x
topology: tpu7x:2x2x1
jax: 0.10.0
libtpu: 0.0.40
codegen_flags: <defaults>
</compile_context>

<pallas_src>
import math
from functools import partial

import numpy as np

import jax
import jax.numpy as jnp
from jax.experimental import pallas as pl
from jax.experimental.pallas import tpu as pltpu


def _tap_validity_masks(H, W, KH, KW):
    """(KH*KW, H*W) float32 masks: 1.0 where the tap reads inside the image."""
    PH, PW = (KH - 1) // 2, (KW - 1) // 2
    hh = np.arange(H)[:, None]
    ww = np.arange(W)[None, :]
    masks = np.zeros((KH * KW, H * W), np.float32)
    t = 0
    for kh in range(KH):
        dh = kh - PH
        for kw in range(KW):
            dw = kw - PW
            ok = (hh + dh >= 0) & (hh + dh < H) & (ww + dw >= 0) & (ww + dw < W)
            masks[t] = ok.reshape(-1).astype(np.float32)
            t += 1
    return masks


def _cbam_kernel(mw_ref, w1m_ref, w1a_ref, b1_ref, w2_ref, b2_ref, x_ref,
                 o_ref, pk_ref, *, BB, C, H, W, KH, KW):
    HW = H * W
    PH, PW = (KH - 1) // 2, (KW - 1) // 2

    def sigmoid(z):
        # NOTE: pl.reciprocal(..., approx=True) would push the divide onto the
        # EUP slot, but the exact form is kept so the 1e-4 numerics check holds
        # (cost is negligible: 2 sigmoids on a handful of vregs per block).
        return 1.0 / (1.0 + jnp.exp(-z))

    inv_hw = 1.0 / HW
    inv_c = 1.0 / C

    w1m = w1m_ref[...]          # (C, hid)   Linear1 weights, max half (transposed)
    w1a = w1a_ref[...]          # (C, hid)   Linear1 weights, avg half (transposed)
    b1 = b1_ref[...]            # (1, hid)
    w2 = w2_ref[...]            # (2C, hid)
    b2 = b2_ref[...]            # (2C, 1)

    # ---------------- Channel attention + channel scaling ----------------
    # BB is a small static constant (4); the per-batch MLP is tiny compared to
    # the 49-tap conv, so a static unroll keeps the known-good formulation.
    out1 = []
    for b in range(BB):
        xb = x_ref[b].astype(jnp.float32)                        # (C, HW)
        m_col = jnp.max(xb, axis=-1, keepdims=True)              # (C, 1)
        a_col = jnp.sum(xb, axis=-1, keepdims=True) * inv_hw     # (C, 1)
        h = jnp.sum(m_col * w1m + a_col * w1a, axis=0, keepdims=True) + b1
        h = jnp.maximum(h, 0.0)                                  # (1, hid)
        o_col = jnp.sum(w2 * h, axis=-1, keepdims=True) + b2     # (2C, 1)
        c_attn = sigmoid(o_col[:C] + o_col[C:])                  # (C, 1)
        o1 = c_attn * xb                                         # (C, HW)
        out1.append(o1)
        # Pack the spatial-attention inputs along sublanes:
        #   rows [0, BB)   = per-image channel-max maps  (conv in-channel 0)
        #   rows [BB, 2BB) = per-image channel-mean maps (conv in-channel 1)
        pk_ref[pl.ds(b, 1), :] = jnp.max(o1, axis=0, keepdims=True)
        pk_ref[pl.ds(BB + b, 1), :] = jnp.sum(o1, axis=0, keepdims=True) * inv_c

    packed = pk_ref[...]                                         # (2*BB, HW)

    # ---------------- Spatial attention: 7x7 "same" conv ----------------
    # Each tap: one static lane rotation (XLU) of the packed (8, HW) operand,
    # one multiply by the precomputed (mask * weight) tile, one add.  Four
    # round-robin accumulators keep the FMA chains independent.
    n_acc = 4
    acc = [jnp.zeros((2 * BB, HW), jnp.float32) for _ in range(n_acc)]
    t = 0
    for kh in range(KH):
        dh = kh - PH
        for kw in range(KW):
            dw = kw - PW
            shift = (-(dh * W + dw)) % HW          # static python int
            acc[t % n_acc] = acc[t % n_acc] + pltpu.roll(packed, shift, 1) * mw_ref[t]
            t += 1
    conv = (acc[0] + acc[1]) + (acc[2] + acc[3])                 # (2*BB, HW)
    conv = conv[:BB] + conv[BB:]      # sublane reduce: ch0(max) + ch1(avg) per image
    # SpatialConv2d.forward() never passes self.bias to F.conv2d -> no bias add.
    s_attn = sigmoid(conv)                                       # (BB, HW)

    for b in range(BB):
        o_ref[b] = (s_attn[b:b + 1, :] * out1[b]).astype(o_ref.dtype)


def cbam_forward(x, conv_weight, w1, b1, w2, b2, stride=(1, 1)):
    """x: (B,C,H,W); conv_weight: (1,2,KH,KW); w1: (hid,2C); b1: (hid,);
    w2: (2C,hid); b2: (2C,)."""
    B, C, H, W = x.shape
    C_out, C_in, KH, KW = conv_weight.shape
    assert (C_out, C_in) == (1, 2), "CBAM spatial conv is 2 -> 1 channels"
    # Module padding int((S*(x-1)+K-x)/2) with odd K, stride 1 == (K-1)//2
    # "same" padding, implemented via masked taps.
    # TODO(synk): stride > 1 / even kernel sizes are not implemented here.
    assert stride == (1, 1) and KH % 2 == 1 and KW % 2 == 1
    hidden = w1.shape[0]
    assert w1.shape == (hidden, 2 * C) and w2.shape == (2 * C, hidden)
    HW = H * W
    KK = KH * KW
    # The roll-based conv assumes a lane-dense flattened spatial axis.
    # TODO(synk): pad HW to a multiple of 128 (masks already support it) for
    # arbitrary feature-map sizes.
    assert HW % 128 == 0, "flattened spatial dim must be a multiple of 128"

    # Batch blocking: 4 images per grid step so {max, avg} x 4 images fill all
    # 8 sublanes of the packed conv operand.  Ragged batches are zero-padded
    # (pad images produce finite garbage that is sliced off).
    BB = 4
    G = pl.cdiv(B, BB)
    B_pad = G * BB
    x_flat = x.reshape(B, C, HW)
    if B_pad != B:
        x_flat = jnp.pad(x_flat, ((0, B_pad - B), (0, 0), (0, 0)))

    # Tiny MLP weights pre-split/transposed: channel axis lives on sublanes
    # in-kernel, so no in-kernel transposes or MXU matmuls are needed.
    w1m_t = jnp.transpose(w1[:, :C])                 # (C, hidden) -- max half
    w1a_t = jnp.transpose(w1[:, C:])                 # (C, hidden) -- avg half
    b1_row = b1.reshape(1, hidden)
    b2_col = b2.reshape(2 * C, 1)

    # Precompute (validity mask * conv weight), tiled to the packed sublane
    # layout: mw[t] is (2*BB, HW) with rows [0,BB) = w_max[t]*mask[t] and rows
    # [BB,2BB) = w_avg[t]*mask[t].  Geometry+weights only -> one constant-index
    # VMEM input, DMA'd once.
    masks = jnp.asarray(_tap_validity_masks(H, W, KH, KW))        # (KK, HW)
    wk = conv_weight.reshape(2, KK).astype(jnp.float32)           # row0=max, row1=avg
    mw = jnp.concatenate(
        [jnp.broadcast_to((masks * wk[0][:, None])[:, None, :], (KK, BB, HW)),
         jnp.broadcast_to((masks * wk[1][:, None])[:, None, :], (KK, BB, HW))],
        axis=1)                                                   # (KK, 2*BB, HW)

    kernel = partial(_cbam_kernel, BB=BB, C=C, H=H, W=W, KH=KH, KW=KW)

    out = pl.pallas_call(
        kernel,
        out_shape=jax.ShapeDtypeStruct((B_pad, C, HW), x.dtype),
        grid=(G,),
        in_specs=[
            pl.BlockSpec((KK, 2 * BB, HW), lambda g: (0, 0, 0)),   # mask*weight
            pl.BlockSpec((C, hidden), lambda g: (0, 0)),           # w1m_t
            pl.BlockSpec((C, hidden), lambda g: (0, 0)),           # w1a_t
            pl.BlockSpec((1, hidden), lambda g: (0, 0)),           # b1
            pl.BlockSpec((2 * C, hidden), lambda g: (0, 0)),       # w2
            pl.BlockSpec((2 * C, 1), lambda g: (0, 0)),            # b2
            pl.BlockSpec((BB, C, HW), lambda g: (g, 0, 0)),        # x block
        ],
        out_specs=pl.BlockSpec((BB, C, HW), lambda g: (g, 0, 0)),
        scratch_shapes=[pltpu.VMEM((2 * BB, HW), jnp.float32)],    # packed maps
        compiler_params=pltpu.CompilerParams(
            dimension_semantics=("parallel",),          # batch blocks over TCs
            vmem_limit_bytes=32 * 1024 * 1024),         # explicit (v7x: 64 MiB phys)
        # TODO(synk): for production-size feature maps additionally tile HW
        # into lane-aligned row chunks with a (KH-1)//2-row halo.
    )(mw, w1m_t, w1a_t, b1_row, w2, b2_col, x_flat)

    return out[:B].reshape(B, C, H, W)


def cbam_reference(x, conv_w, w1, b1, w2, b2):
    """Plain-XLA reference of the PyTorch forward (float32, highest precision)."""
    B, C, H, W = x.shape
    mx = jnp.max(x, axis=(2, 3))
    av = jnp.mean(x, axis=(2, 3))
    v = jnp.concatenate([mx, av], axis=1)                              # (B, 2C)
    h = jnp.maximum(jnp.dot(v, w1.T, precision=jax.lax.Precision.HIGHEST) + b1, 0.0)
    o = jnp.dot(h, w2.T, precision=jax.lax.Precision.HIGHEST) + b2     # (B, 2C)
    c_attn = jax.nn.sigmoid(o[:, :C] + o[:, C:])[:, :, None, None]
    out1 = c_attn * x
    ch_max = jnp.max(out1, axis=1, keepdims=True)
    ch_avg = jnp.mean(out1, axis=1, keepdims=True)
    conv_in = jnp.concatenate([ch_max, ch_avg], axis=1)
    KH, KW = conv_w.shape[2], conv_w.shape[3]
    PH, PW = (KH - 1) // 2, (KW - 1) // 2
    conv_out = jax.lax.conv_general_dilated(
        conv_in, conv_w, (1, 1), [(PH, PH), (PW, PW)],
        dimension_numbers=("NCHW", "OIHW", "NCHW"),
        precision=jax.lax.Precision.HIGHEST)
    s_attn = jax.nn.sigmoid(conv_out)
    return s_attn * out1


if __name__ == "__main__":
    # CBAM(C=4, ratio=2, kernel_size=7, stride=1) on small feature maps.
    B, C, H, W = 8, 4, 16, 16
    ratio = 2
    KH, KW = 7, 7
    hidden = 2 * C // ratio

    key = jax.random.PRNGKey(0)
    k = jax.random.split(key, 8)

    # ChannelAttention MLP params (PyTorch nn.Linear default-init style).
    b1_bound = 1.0 / math.sqrt(2 * C)
    w1 = jax.random.uniform(k[0], (hidden, 2 * C), jnp.float32, -b1_bound, b1_bound)
    b1 = jax.random.uniform(k[1], (hidden,), jnp.float32, -b1_bound, b1_bound)
    b2_bound = 1.0 / math.sqrt(hidden)
    w2 = jax.random.uniform(k[2], (2 * C, hidden), jnp.float32, -b2_bound, b2_bound)
    b2 = jax.random.uniform(k[3], (2 * C,), jnp.float32, -b2_bound, b2_bound)

    # SpatialConv2d weight: kaiming_uniform_(a=sqrt(5)) => U(-1/sqrt(fan_in), +).
    fan_in = 2 * KH * KW
    cbound = 1.0 / math.sqrt(fan_in)
    conv_w = jax.random.uniform(k[4], (1, 2, KH, KW), jnp.float32, -cbound, cbound)
    # The module also initializes a conv bias, but forward() never applies it.

    # Main test: B multiple of the batch block (2 grid steps).
    x = jax.random.normal(k[5], (B, C, H, W), dtype=jnp.float32)
    out = jax.block_until_ready(cbam_forward(x, conv_w, w1, b1, w2, b2))
    ref = cbam_reference(x, conv_w, w1, b1, w2, b2)
    assert out.shape == ref.shape, (out.shape, ref.shape)
    max_err = float(jnp.max(jnp.abs(out - ref)))
    assert jnp.allclose(out, ref, atol=1e-4, rtol=1e-4), f"mismatch, max|err|={max_err}"

    # Secondary test: B not a multiple of the batch block (pad/slice path).
    x2 = jax.random.normal(k[6], (2, C, H, W), dtype=jnp.float32)
    out2 = jax.block_until_ready(cbam_forward(x2, conv_w, w1, b1, w2, b2))
    ref2 = cbam_reference(x2, conv_w, w1, b1, w2, b2)
    max_err2 = float(jnp.max(jnp.abs(out2 - ref2)))
    assert jnp.allclose(out2, ref2, atol=1e-4, rtol=1e-4), f"mismatch, max|err|={max_err2}"

    print("KERNEL_OK")
</pallas_src>

<mosaic_0001>
module attributes {stable_mosaic.version = 11 : i64} {
  func.func @_cbam_kernel(%arg0: i32, %arg1: memref<49x8x256xf32, #tpu.memory_space<vmem>>, %arg2: memref<4x4xf32, #tpu.memory_space<vmem>>, %arg3: memref<4x4xf32, #tpu.memory_space<vmem>>, %arg4: memref<1x4xf32, #tpu.memory_space<vmem>>, %arg5: memref<8x4xf32, #tpu.memory_space<vmem>>, %arg6: memref<8x1xf32, #tpu.memory_space<vmem>>, %arg7: memref<4x4x256xf32, #tpu.memory_space<vmem>>, %arg8: memref<4x4x256xf32, #tpu.memory_space<vmem>>, %arg9: memref<8x256xf32, #tpu.memory_space<vmem>>) attributes {dimension_semantics = [#tpu.dimension_semantics<parallel>], iteration_bounds = array<i64: 2>, scalar_prefetch = 0 : i64, scratch_operands = 1 : i64, tpu.core_type = #tpu.core_type<tc>, window_params = [{pipeline_mode = #tpu.pipeline_mode<synchronous>, transform_indices = @transform_0, window_bounds = array<i64: 49, 8, 256>}, {pipeline_mode = #tpu.pipeline_mode<synchronous>, transform_indices = @transform_1, window_bounds = array<i64: 4, 4>}, {pipeline_mode = #tpu.pipeline_mode<synchronous>, transform_indices = @transform_2, window_bounds = array<i64: 4, 4>}, {pipeline_mode = #tpu.pipeline_mode<synchronous>, transform_indices = @transform_3, window_bounds = array<i64: 1, 4>}, {pipeline_mode = #tpu.pipeline_mode<synchronous>, transform_indices = @transform_4, window_bounds = array<i64: 8, 4>}, {pipeline_mode = #tpu.pipeline_mode<synchronous>, transform_indices = @transform_5, window_bounds = array<i64: 8, 1>}, {transform_indices = @transform_6, window_bounds = array<i64: 4, 4, 256>}, {transform_indices = @transform_7, window_bounds = array<i64: 4, 4, 256>}]} {
    %c0 = arith.constant 0 : index
    %c0_0 = arith.constant 0 : index
    %0 = vector.load %arg2[%c0, %c0_0] : memref<4x4xf32, #tpu.memory_space<vmem>>, vector<4x4xf32>
    %c0_1 = arith.constant 0 : index
    %c0_2 = arith.constant 0 : index
    %1 = vector.load %arg3[%c0_1, %c0_2] : memref<4x4xf32, #tpu.memory_space<vmem>>, vector<4x4xf32>
    %c0_3 = arith.constant 0 : index
    %c0_4 = arith.constant 0 : index
    %2 = vector.load %arg4[%c0_3, %c0_4] : memref<1x4xf32, #tpu.memory_space<vmem>>, vector<1x4xf32>
    %c0_5 = arith.constant 0 : index
    %c0_6 = arith.constant 0 : index
    %3 = vector.load %arg5[%c0_5, %c0_6] : memref<8x4xf32, #tpu.memory_space<vmem>>, vector<8x4xf32>
    %c0_7 = arith.constant 0 : index
    %c0_8 = arith.constant 0 : index
    %4 = vector.load %arg6[%c0_7, %c0_8] : memref<8x1xf32, #tpu.memory_space<vmem>>, vector<8x1xf32>
    %c0_9 = arith.constant 0 : index
    %c0_10 = arith.constant 0 : index
    %c0_11 = arith.constant 0 : index
    %5 = vector.load %arg7[%c0_9, %c0_10, %c0_11] : memref<4x4x256xf32, #tpu.memory_space<vmem>>, vector<1x4x256xf32>
    %6 = vector.shape_cast %5 : vector<1x4x256xf32> to vector<4x256xf32>
    %cst = arith.constant dense<0xFF800000> : vector<4xf32>
    %7 = vector.multi_reduction <maximumf>, %6, %cst [1] : vector<4x256xf32> to vector<4xf32>
    %8 = vector.shape_cast %7 : vector<4xf32> to vector<4x1xf32>
    %cst_12 = arith.constant dense<0.000000e+00> : vector<4xf32>
    %9 = vector.multi_reduction <add>, %6, %cst_12 [1] : vector<4x256xf32> to vector<4xf32>
    %10 = vector.shape_cast %9 : vector<4xf32> to vector<4x1xf32>
    %cst_13 = arith.constant 3.906250e-03 : f32
    %11 = vector.broadcast %cst_13 : f32 to vector<4x1xf32>
    %12 = arith.mulf %10, %11 : vector<4x1xf32>
    %13 = vector.broadcast %8 : vector<4x1xf32> to vector<4x4xf32>
    %14 = arith.mulf %13, %0 : vector<4x4xf32>
    %15 = vector.broadcast %12 : vector<4x1xf32> to vector<4x4xf32>
    %16 = arith.mulf %15, %1 : vector<4x4xf32>
    %17 = arith.addf %14, %16 : vector<4x4xf32>
    %cst_14 = arith.constant dense<0.000000e+00> : vector<4xf32>
    %18 = vector.multi_reduction <add>, %17, %cst_14 [0] : vector<4x4xf32> to vector<4xf32>
    %19 = vector.shape_cast %18 : vector<4xf32> to vector<1x4xf32>
    %20 = arith.addf %19, %2 : vector<1x4xf32>
    %cst_15 = arith.constant 0.000000e+00 : f32
    %21 = vector.broadcast %cst_15 : f32 to vector<1x4xf32>
    %22 = arith.maximumf %20, %21 : vector<1x4xf32>
    %23 = vector.broadcast %22 : vector<1x4xf32> to vector<8x4xf32>
    %24 = arith.mulf %3, %23 : vector<8x4xf32>
    %cst_16 = arith.constant dense<0.000000e+00> : vector<8xf32>
    %25 = vector.multi_reduction <add>, %24, %cst_16 [1] : vector<8x4xf32> to vector<8xf32>
    %26 = vector.shape_cast %25 : vector<8xf32> to vector<8x1xf32>
    %27 = arith.addf %26, %4 : vector<8x1xf32>
    %28 = vector.extract_strided_slice %27 {offsets = [0, 0], sizes = [4, 1], strides = [1, 1]} : vector<8x1xf32> to vector<4x1xf32>
    %29 = vector.extract_strided_slice %27 {offsets = [4, 0], sizes = [4, 1], strides = [1, 1]} : vector<8x1xf32> to vector<4x1xf32>
    %30 = arith.addf %28, %29 : vector<4x1xf32>
    %cst_17 = arith.constant 0.000000e+00 : f32
    %31 = vector.broadcast %cst_17 : f32 to vector<4x1xf32>
    %32 = arith.subf %31, %30 : vector<4x1xf32>
    %33 = math.exp %32 : vector<4x1xf32>
    %cst_18 = arith.constant 1.000000e+00 : f32
    %34 = vector.broadcast %cst_18 : f32 to vector<4x1xf32>
    %35 = arith.addf %34, %33 : vector<4x1xf32>
    %cst_19 = arith.constant 1.000000e+00 : f32
    %36 = vector.broadcast %cst_19 : f32 to vector<4x1xf32>
    %37 = arith.divf %36, %35 : vector<4x1xf32>
    %38 = vector.broadcast %37 : vector<4x1xf32> to vector<4x256xf32>
    %39 = arith.mulf %38, %6 : vector<4x256xf32>
    %cst_20 = arith.constant dense<0xFF800000> : vector<256xf32>
    %40 = vector.multi_reduction <maximumf>, %39, %cst_20 [0] : vector<4x256xf32> to vector<256xf32>
    %41 = vector.shape_cast %40 : vector<256xf32> to vector<1x256xf32>
    %c0_21 = arith.constant 0 : index
    %c0_22 = arith.constant 0 : index
    %42 = vector.load %arg9[%c0_21, %c0_22] : memref<8x256xf32, #tpu.memory_space<vmem>>, vector<1x256xf32>
    tpu.vector_store %arg9[%c0_21, %c0_22], %41 {strides = array<i32>} : memref<8x256xf32, #tpu.memory_space<vmem>>, vector<1x256xf32>,
    %cst_23 = arith.constant dense<0.000000e+00> : vector<256xf32>
    %43 = vector.multi_reduction <add>, %39, %cst_23 [0] : vector<4x256xf32> to vector<256xf32>
    %44 = vector.shape_cast %43 : vector<256xf32> to vector<1x256xf32>
    %cst_24 = arith.constant 2.500000e-01 : f32
    %45 = vector.broadcast %cst_24 : f32 to vector<1x256xf32>
    %46 = arith.mulf %44, %45 : vector<1x256xf32>
    %c4 = arith.constant 4 : index
    %c0_25 = arith.constant 0 : index
    %47 = vector.load %arg9[%c4, %c0_25] : memref<8x256xf32, #tpu.memory_space<vmem>>, vector<1x256xf32>
    tpu.vector_store %arg9[%c4, %c0_25], %46 {strides = array<i32>} : memref<8x256xf32, #tpu.memory_space<vmem>>, vector<1x256xf32>,
    %c1 = arith.constant 1 : index
    %c0_26 = arith.constant 0 : index
    %c0_27 = arith.constant 0 : index
    %48 = vector.load %arg7[%c1, %c0_26, %c0_27] : memref<4x4x256xf32, #tpu.memory_space<vmem>>, vector<1x4x256xf32>
    %49 = vector.shape_cast %48 : vector<1x4x256xf32> to vector<4x256xf32>
    %cst_28 = arith.constant dense<0xFF800000> : vector<4xf32>
    %50 = vector.multi_reduction <maximumf>, %49, %cst_28 [1] : vector<4x256xf32> to vector<4xf32>
    %51 = vector.shape_cast %50 : vector<4xf32> to vector<4x1xf32>
    %cst_29 = arith.constant dense<0.000000e+00> : vector<4xf32>
    %52 = vector.multi_reduction <add>, %49, %cst_29 [1] : vector<4x256xf32> to vector<4xf32>
    %53 = vector.shape_cast %52 : vector<4xf32> to vector<4x1xf32>
    %cst_30 = arith.constant 3.906250e-03 : f32
    %54 = vector.broadcast %cst_30 : f32 to vector<4x1xf32>
    %55 = arith.mulf %53, %54 : vector<4x1xf32>
    %56 = vector.broadcast %51 : vector<4x1xf32> to vector<4x4xf32>
    %57 = arith.mulf %56, %0 : vector<4x4xf32>
    %58 = vector.broadcast %55 : vector<4x1xf32> to vector<4x4xf32>
    %59 = arith.mulf %58, %1 : vector<4x4xf32>
    %60 = arith.addf %57, %59 : vector<4x4xf32>
    %cst_31 = arith.constant dense<0.000000e+00> : vector<4xf32>
    %61 = vector.multi_reduction <add>, %60, %cst_31 [0] : vector<4x4xf32> to vector<4xf32>
    %62 = vector.shape_cast %61 : vector<4xf32> to vector<1x4xf32>
    %63 = arith.addf %62, %2 : vector<1x4xf32>
    %cst_32 = arith.constant 0.000000e+00 : f32
    %64 = vector.broadcast %cst_32 : f32 to vector<1x4xf32>
    %65 = arith.maximumf %63, %64 : vector<1x4xf32>
    %66 = vector.broadcast %65 : vector<1x4xf32> to vector<8x4xf32>
    %67 = arith.mulf %3, %66 : vector<8x4xf32>
    %cst_33 = arith.constant dense<0.000000e+00> : vector<8xf32>
    %68 = vector.multi_reduction <add>, %67, %cst_33 [1] : vector<8x4xf32> to vector<8xf32>
    %69 = vector.shape_cast %68 : vector<8xf32> to vector<8x1xf32>
    %70 = arith.addf %69, %4 : vector<8x1xf32>
    %71 = vector.extract_strided_slice %70 {offsets = [0, 0], sizes = [4, 1], strides = [1, 1]} : vector<8x1xf32> to vector<4x1xf32>
    %72 = vector.extract_strided_slice %70 {offsets = [4, 0], sizes = [4, 1], strides = [1, 1]} : vector<8x1xf32> to vector<4x1xf32>
    %73 = arith.addf %71, %72 : vector<4x1xf32>
    %cst_34 = arith.constant 0.000000e+00 : f32
    %74 = vector.broadcast %cst_34 : f32 to vector<4x1xf32>
    %75 = arith.subf %74, %73 : vector<4x1xf32>
    %76 = math.exp %75 : vector<4x1xf32>
    %cst_35 = arith.constant 1.000000e+00 : f32
    %77 = vector.broadcast %cst_35 : f32 to vector<4x1xf32>
    %78 = arith.addf %77, %76 : vector<4x1xf32>
    %cst_36 = arith.constant 1.000000e+00 : f32
    %79 = vector.broadcast %cst_36 : f32 to vector<4x1xf32>
    %80 = arith.divf %79, %78 : vector<4x1xf32>
    %81 = vector.broadcast %80 : vector<4x1xf32> to vector<4x256xf32>
    %82 = arith.mulf %81, %49 : vector<4x256xf32>
    %cst_37 = arith.constant dense<0xFF800000> : vector<256xf32>
    %83 = vector.multi_reduction <maximumf>, %82, %cst_37 [0] : vector<4x256xf32> to vector<256xf32>
    %84 = vector.shape_cast %83 : vector<256xf32> to vector<1x256xf32>
    %c1_38 = arith.constant 1 : index
    %c0_39 = arith.constant 0 : index
    %85 = vector.load %arg9[%c1_38, %c0_39] : memref<8x256xf32, #tpu.memory_space<vmem>>, vector<1x256xf32>
    tpu.vector_store %arg9[%c1_38, %c0_39], %84 {strides = array<i32>} : memref<8x256xf32, #tpu.memory_space<vmem>>, vector<1x256xf32>,
    %cst_40 = arith.constant dense<0.000000e+00> : vector<256xf32>
    %86 = vector.multi_reduction <add>, %82, %cst_40 [0] : vector<4x256xf32> to vector<256xf32>
    %87 = vector.shape_cast %86 : vector<256xf32> to vector<1x256xf32>
    %cst_41 = arith.constant 2.500000e-01 : f32
    %88 = vector.broadcast %cst_41 : f32 to vector<1x256xf32>
    %89 = arith.mulf %87, %88 : vector<1x256xf32>
    %c5 = arith.constant 5 : index
    %c0_42 = arith.constant 0 : index
    %90 = vector.load %arg9[%c5, %c0_42] : memref<8x256xf32, #tpu.memory_space<vmem>>, vector<1x256xf32>
    tpu.vector_store %arg9[%c5, %c0_42], %89 {strides = array<i32>} : memref<8x256xf32, #tpu.memory_space<vmem>>, vector<1x256xf32>,
    %c2 = arith.constant 2 : index
    %c0_43 = arith.constant 0 : index
    %c0_44 = arith.constant 0 : index
    %91 = vector.load %arg7[%c2, %c0_43, %c0_44] : memref<4x4x256xf32, #tpu.memory_space<vmem>>, vector<1x4x256xf32>
    %92 = vector.shape_cast %91 : vector<1x4x256xf32> to vector<4x256xf32>
    %cst_45 = arith.constant dense<0xFF800000> : vector<4xf32>
    %93 = vector.multi_reduction <maximumf>, %92, %cst_45 [1] : vector<4x256xf32> to vector<4xf32>
    %94 = vector.shape_cast %93 : vector<4xf32> to vector<4x1xf32>
    %cst_46 = arith.constant dense<0.000000e+00> : vector<4xf32>
    %95 = vector.multi_reduction <add>, %92, %cst_46 [1] : vector<4x256xf32> to vector<4xf32>
    %96 = vector.shape_cast %95 : vector<4xf32> to vector<4x1xf32>
    %cst_47 = arith.constant 3.906250e-03 : f32
    %97 = vector.broadcast %cst_47 : f32 to vector<4x1xf32>
    %98 = arith.mulf %96, %97 : vector<4x1xf32>
    %99 = vector.broadcast %94 : vector<4x1xf32> to vector<4x4xf32>
    %100 = arith.mulf %99, %0 : vector<4x4xf32>
    %101 = vector.broadcast %98 : vector<4x1xf32> to vector<4x4xf32>
    %102 = arith.mulf %101, %1 : vector<4x4xf32>
    %103 = arith.addf %100, %102 : vector<4x4xf32>
    %cst_48 = arith.constant dense<0.000000e+00> : vector<4xf32>
    %104 = vector.multi_reduction <add>, %103, %cst_48 [0] : vector<4x4xf32> to vector<4xf32>
    %105 = vector.shape_cast %104 : vector<4xf32> to vector<1x4xf32>
    %106 = arith.addf %105, %2 : vector<1x4xf32>
    %cst_49 = arith.constant 0.000000e+00 : f32
    %107 = vector.broadcast %cst_49 : f32 to vector<1x4xf32>
    %108 = arith.maximumf %106, %107 : vector<1x4xf32>
    %109 = vector.broadcast %108 : vector<1x4xf32> to vector<8x4xf32>
    %110 = arith.mulf %3, %109 : vector<8x4xf32>
    %cst_50 = arith.constant dense<0.000000e+00> : vector<8xf32>
    %111 = vector.multi_reduction <add>, %110, %cst_50 [1] : vector<8x4xf32> to vector<8xf32>
    %112 = vector.shape_cast %111 : vector<8xf32> to vector<8x1xf32>
    %113 = arith.addf %112, %4 : vector<8x1xf32>
    %114 = vector.extract_strided_slice %113 {offsets = [0, 0], sizes = [4, 1], strides = [1, 1]} : vector<8x1xf32> to vector<4x1xf32>
    %115 = vector.extract_strided_slice %113 {offsets = [4, 0], sizes = [4, 1], strides = [1, 1]} : vector<8x1xf32> to vector<4x1xf32>
    %116 = arith.addf %114, %115 : vector<4x1xf32>
    %cst_51 = arith.constant 0.000000e+00 : f32
    %117 = vector.broadcast %cst_51 : f32 to vector<4x1xf32>
    %118 = arith.subf %117, %116 : vector<4x1xf32>
    %119 = math.exp %118 : vector<4x1xf32>
    %cst_52 = arith.constant 1.000000e+00 : f32
    %120 = vector.broadcast %cst_52 : f32 to vector<4x1xf32>
    %121 = arith.addf %120, %119 : vector<4x1xf32>
    %cst_53 = arith.constant 1.000000e+00 : f32
    %122 = vector.broadcast %cst_53 : f32 to vector<4x1xf32>
    %123 = arith.divf %122, %121 : vector<4x1xf32>
    %124 = vector.broadcast %123 : vector<4x1xf32> to vector<4x256xf32>
    %125 = arith.mulf %124, %92 : vector<4x256xf32>
    %cst_54 = arith.constant dense<0xFF800000> : vector<256xf32>
    %126 = vector.multi_reduction <maximumf>, %125, %cst_54 [0] : vector<4x256xf32> to vector<256xf32>
    %127 = vector.shape_cast %126 : vector<256xf32> to vector<1x256xf32>
    %c2_55 = arith.constant 2 : index
    %c0_56 = arith.constant 0 : index
    %128 = vector.load %arg9[%c2_55, %c0_56] : memref<8x256xf32, #tpu.memory_space<vmem>>, vector<1x256xf32>
    tpu.vector_store %arg9[%c2_55, %c0_56], %127 {strides = array<i32>} : memref<8x256xf32, #tpu.memory_space<vmem>>, vector<1x256xf32>,
    %cst_57 = arith.constant dense<0.000000e+00> : vector<256xf32>
    %129 = vector.multi_reduction <add>, %125, %cst_57 [0] : vector<4x256xf32> to vector<256xf32>
    %130 = vector.shape_cast %129 : vector<256xf32> to vector<1x256xf32>
    %cst_58 = arith.constant 2.500000e-01 : f32
    %131 = vector.broadcast %cst_58 : f32 to vector<1x256xf32>
    %132 = arith.mulf %130, %131 : vector<1x256xf32>
    %c6 = arith.constant 6 : index
    %c0_59 = arith.constant 0 : index
    %133 = vector.load %arg9[%c6, %c0_59] : memref<8x256xf32, #tpu.memory_space<vmem>>, vector<1x256xf32>
    tpu.vector_store %arg9[%c6, %c0_59], %132 {strides = array<i32>} : memref<8x256xf32, #tpu.memory_space<vmem>>, vector<1x256xf32>,
    %c3 = arith.constant 3 : index
    %c0_60 = arith.constant 0 : index
    %c0_61 = arith.constant 0 : index
    %134 = vector.load %arg7[%c3, %c0_60, %c0_61] : memref<4x4x256xf32, #tpu.memory_space<vmem>>, vector<1x4x256xf32>
    %135 = vector.shape_cast %134 : vector<1x4x256xf32> to vector<4x256xf32>
    %cst_62 = arith.constant dense<0xFF800000> : vector<4xf32>
    %136 = vector.multi_reduction <maximumf>, %135, %cst_62 [1] : vector<4x256xf32> to vector<4xf32>
    %137 = vector.shape_cast %136 : vector<4xf32> to vector<4x1xf32>
    %cst_63 = arith.constant dense<0.000000e+00> : vector<4xf32>
    %138 = vector.multi_reduction <add>, %135, %cst_63 [1] : vector<4x256xf32> to vector<4xf32>
    %139 = vector.shape_cast %138 : vector<4xf32> to vector<4x1xf32>
    %cst_64 = arith.constant 3.906250e-03 : f32
    %140 = vector.broadcast %cst_64 : f32 to vector<4x1xf32>
    %141 = arith.mulf %139, %140 : vector<4x1xf32>
    %142 = vector.broadcast %137 : vector<4x1xf32> to vector<4x4xf32>
    %143 = arith.mulf %142, %0 : vector<4x4xf32>
    %144 = vector.broadcast %141 : vector<4x1xf32> to vector<4x4xf32>
    %145 = arith.mulf %144, %1 : vector<4x4xf32>
    %146 = arith.addf %143, %145 : vector<4x4xf32>
    %cst_65 = arith.constant dense<0.000000e+00> : vector<4xf32>
    %147 = vector.multi_reduction <add>, %146, %cst_65 [0] : vector<4x4xf32> to vector<4xf32>
    %148 = vector.shape_cast %147 : vector<4xf32> to vector<1x4xf32>
    %149 = arith.addf %148, %2 : vector<1x4xf32>
    %cst_66 = arith.constant 0.000000e+00 : f32
    %150 = vector.broadcast %cst_66 : f32 to vector<1x4xf32>
    %151 = arith.maximumf %149, %150 : vector<1x4xf32>
    %152 = vector.broadcast %151 : vector<1x4xf32> to vector<8x4xf32>
    %153 = arith.mulf %3, %152 : vector<8x4xf32>
    %cst_67 = arith.constant dense<0.000000e+00> : vector<8xf32>
    %154 = vector.multi_reduction <add>, %153, %cst_67 [1] : vector<8x4xf32> to vector<8xf32>
    %155 = vector.shape_cast %154 : vector<8xf32> to vector<8x1xf32>
    %156 = arith.addf %155, %4 : vector<8x1xf32>
    %157 = vector.extract_strided_slice %156 {offsets = [0, 0], sizes = [4, 1], strides = [1, 1]} : vector<8x1xf32> to vector<4x1xf32>
    %158 = vector.extract_strided_slice %156 {offsets = [4, 0], sizes = [4, 1], strides = [1, 1]} : vector<8x1xf32> to vector<4x1xf32>
    %159 = arith.addf %157, %158 : vector<4x1xf32>
    %cst_68 = arith.constant 0.000000e+00 : f32
    %160 = vector.broadcast %cst_68 : f32 to vector<4x1xf32>
    %161 = arith.subf %160, %159 : vector<4x1xf32>
    %162 = math.exp %161 : vector<4x1xf32>
    %cst_69 = arith.constant 1.000000e+00 : f32
    %163 = vector.broadcast %cst_69 : f32 to vector<4x1xf32>
    %164 = arith.addf %163, %162 : vector<4x1xf32>
    %cst_70 = arith.constant 1.000000e+00 : f32
    %165 = vector.broadcast %cst_70 : f32 to vector<4x1xf32>
    %166 = arith.divf %165, %164 : vector<4x1xf32>
    %167 = vector.broadcast %166 : vector<4x1xf32> to vector<4x256xf32>
    %168 = arith.mulf %167, %135 : vector<4x256xf32>
    %cst_71 = arith.constant dense<0xFF800000> : vector<256xf32>
    %169 = vector.multi_reduction <maximumf>, %168, %cst_71 [0] : vector<4x256xf32> to vector<256xf32>
    %170 = vector.shape_cast %169 : vector<256xf32> to vector<1x256xf32>
    %c3_72 = arith.constant 3 : index
    %c0_73 = arith.constant 0 : index
    %171 = vector.load %arg9[%c3_72, %c0_73] : memref<8x256xf32, #tpu.memory_space<vmem>>, vector<1x256xf32>
    tpu.vector_store %arg9[%c3_72, %c0_73], %170 {strides = array<i32>} : memref<8x256xf32, #tpu.memory_space<vmem>>, vector<1x256xf32>,
    %cst_74 = arith.constant dense<0.000000e+00> : vector<256xf32>
    %172 = vector.multi_reduction <add>, %168, %cst_74 [0] : vector<4x256xf32> to vector<256xf32>
    %173 = vector.shape_cast %172 : vector<256xf32> to vector<1x256xf32>
    %cst_75 = arith.constant 2.500000e-01 : f32
    %174 = vector.broadcast %cst_75 : f32 to vector<1x256xf32>
    %175 = arith.mulf %173, %174 : vector<1x256xf32>
    %c7 = arith.constant 7 : index
    %c0_76 = arith.constant 0 : index
    %176 = vector.load %arg9[%c7, %c0_76] : memref<8x256xf32, #tpu.memory_space<vmem>>, vector<1x256xf32>
    tpu.vector_store %arg9[%c7, %c0_76], %175 {strides = array<i32>} : memref<8x256xf32, #tpu.memory_space<vmem>>, vector<1x256xf32>,
    %c0_77 = arith.constant 0 : index
    %c0_78 = arith.constant 0 : index
    %177 = vector.load %arg9[%c0_77, %c0_78] : memref<8x256xf32, #tpu.memory_space<vmem>>, vector<8x256xf32>
    %cst_79 = arith.constant 0.000000e+00 : f32
    %178 = vector.broadcast %cst_79 : f32 to vector<8x256xf32>
    %cst_80 = arith.constant 0.000000e+00 : f32
    %179 = vector.broadcast %cst_80 : f32 to vector<8x256xf32>
    %cst_81 = arith.constant 0.000000e+00 : f32
    %180 = vector.broadcast %cst_81 : f32 to vector<8x256xf32>
    %cst_82 = arith.constant 0.000000e+00 : f32
    %181 = vector.broadcast %cst_82 : f32 to vector<8x256xf32>
    %c51_i32 = arith.constant 51 : i32
    %182 = tpu.dynamic_rotate %177 by %c51_i32 dim 1 : vector<8x256xf32>, i32 -> vector<8x256xf32>
    %c0_83 = arith.constant 0 : index
    %c0_84 = arith.constant 0 : index
    %c0_85 = arith.constant 0 : index
    %183 = vector.load %arg1[%c0_83, %c0_84, %c0_85] : memref<49x8x256xf32, #tpu.memory_space<vmem>>, vector<1x8x256xf32>
    %184 = vector.shape_cast %183 : vector<1x8x256xf32> to vector<8x256xf32>
    %185 = arith.mulf %182, %184 : vector<8x256xf32>
    %186 = arith.addf %178, %185 : vector<8x256xf32>
    %c50_i32 = arith.constant 50 : i32
    %187 = tpu.dynamic_rotate %177 by %c50_i32 dim 1 : vector<8x256xf32>, i32 -> vector<8x256xf32>
    %c1_86 = arith.constant 1 : index
    %c0_87 = arith.constant 0 : index
    %c0_88 = arith.constant 0 : index
    %188 = vector.load %arg1[%c1_86, %c0_87, %c0_88] : memref<49x8x256xf32, #tpu.memory_space<vmem>>, vector<1x8x256xf32>
    %189 = vector.shape_cast %188 : vector<1x8x256xf32> to vector<8x256xf32>
    %190 = arith.mulf %187, %189 : vector<8x256xf32>
    %191 = arith.addf %179, %190 : vector<8x256xf32>
    %c49_i32 = arith.constant 49 : i32
    %192 = tpu.dynamic_rotate %177 by %c49_i32 dim 1 : vector<8x256xf32>, i32 -> vector<8x256xf32>
    %c2_89 = arith.constant 2 : index
    %c0_90 = arith.constant 0 : index
    %c0_91 = arith.constant 0 : index
    %193 = vector.load %arg1[%c2_89, %c0_90, %c0_91] : memref<49x8x256xf32, #tpu.memory_space<vmem>>, vector<1x8x256xf32>
    %194 = vector.shape_cast %193 : vector<1x8x256xf32> to vector<8x256xf32>
    %195 = arith.mulf %192, %194 : vector<8x256xf32>
    %196 = arith.addf %180, %195 : vector<8x256xf32>
    %c48_i32 = arith.constant 48 : i32
    %197 = tpu.dynamic_rotate %177 by %c48_i32 dim 1 : vector<8x256xf32>, i32 -> vector<8x256xf32>
    %c3_92 = arith.constant 3 : index
    %c0_93 = arith.constant 0 : index
    %c0_94 = arith.constant 0 : index
    %198 = vector.load %arg1[%c3_92, %c0_93, %c0_94] : memref<49x8x256xf32, #tpu.memory_space<vmem>>, vector<1x8x256xf32>
    %199 = vector.shape_cast %198 : vector<1x8x256xf32> to vector<8x256xf32>
    %200 = arith.mulf %197, %199 : vector<8x256xf32>
    %201 = arith.addf %181, %200 : vector<8x256xf32>
    %c47_i32 = arith.constant 47 : i32
    %202 = tpu.dynamic_rotate %177 by %c47_i32 dim 1 : vector<8x256xf32>, i32 -> vector<8x256xf32>
    %c4_95 = arith.constant 4 : index
    %c0_96 = arith.constant 0 : index
    %c0_97 = arith.constant 0 : index
    %203 = vector.load %arg1[%c4_95, %c0_96, %c0_97] : memref<49x8x256xf32, #tpu.memory_space<vmem>>, vector<1x8x256xf32>
    %204 = vector.shape_cast %203 : vector<1x8x256xf32> to vector<8x256xf32>
    %205 = arith.mulf %202, %204 : vector<8x256xf32>
    %206 = arith.addf %186, %205 : vector<8x256xf32>
    %c46_i32 = arith.constant 46 : i32
    %207 = tpu.dynamic_rotate %177 by %c46_i32 dim 1 : vector<8x256xf32>, i32 -> vector<8x256xf32>
    %c5_98 = arith.constant 5 : index
    %c0_99 = arith.constant 0 : index
    %c0_100 = arith.constant 0 : index
    %208 = vector.load %arg1[%c5_98, %c0_99, %c0_100] : memref<49x8x256xf32, #tpu.memory_space<vmem>>, vector<1x8x256xf32>
    %209 = vector.shape_cast %208 : vector<1x8x256xf32> to vector<8x256xf32>
    %210 = arith.mulf %207, %209 : vector<8x256xf32>
    %211 = arith.addf %191, %210 : vector<8x256xf32>
    %c45_i32 = arith.constant 45 : i32
    %212 = tpu.dynamic_rotate %177 by %c45_i32 dim 1 : vector<8x256xf32>, i32 -> vector<8x256xf32>
    %c6_101 = arith.constant 6 : index
    %c0_102 = arith.constant 0 : index
    %c0_103 = arith.constant 0 : index
    %213 = vector.load %arg1[%c6_101, %c0_102, %c0_103] : memref<49x8x256xf32, #tpu.memory_space<vmem>>, vector<1x8x256xf32>
    %214 = vector.shape_cast %213 : vector<1x8x256xf32> to vector<8x256xf32>
    %215 = arith.mulf %212, %214 : vector<8x256xf32>
    %216 = arith.addf %196, %215 : vector<8x256xf32>
    %c35_i32 = arith.constant 35 : i32
    %217 = tpu.dynamic_rotate %177 by %c35_i32 dim 1 : vector<8x256xf32>, i32 -> vector<8x256xf32>
    %c7_104 = arith.constant 7 : index
    %c0_105 = arith.constant 0 : index
    %c0_106 = arith.constant 0 : index
    %218 = vector.load %arg1[%c7_104, %c0_105, %c0_106] : memref<49x8x256xf32, #tpu.memory_space<vmem>>, vector<1x8x256xf32>
    %219 = vector.shape_cast %218 : vector<1x8x256xf32> to vector<8x256xf32>
    %220 = arith.mulf %217, %219 : vector<8x256xf32>
    %221 = arith.addf %201, %220 : vector<8x256xf32>
    %c34_i32 = arith.constant 34 : i32
    %222 = tpu.dynamic_rotate %177 by %c34_i32 dim 1 : vector<8x256xf32>, i32 -> vector<8x256xf32>
    %c8 = arith.constant 8 : index
    %c0_107 = arith.constant 0 : index
    %c0_108 = arith.constant 0 : index
    %223 = vector.load %arg1[%c8, %c0_107, %c0_108] : memref<49x8x256xf32, #tpu.memory_space<vmem>>, vector<1x8x256xf32>
    %224 = vector.shape_cast %223 : vector<1x8x256xf32> to vector<8x256xf32>
    %225 = arith.mulf %222, %224 : vector<8x256xf32>
    %226 = arith.addf %206, %225 : vector<8x256xf32>
    %c33_i32 = arith.constant 33 : i32
    %227 = tpu.dynamic_rotate %177 by %c33_i32 dim 1 : vector<8x256xf32>, i32 -> vector<8x256xf32>
    %c9 = arith.constant 9 : index
    %c0_109 = arith.constant 0 : index
    %c0_110 = arith.constant 0 : index
    %228 = vector.load %arg1[%c9, %c0_109, %c0_110] : memref<49x8x256xf32, #tpu.memory_space<vmem>>, vector<1x8x256xf32>
    %229 = vector.shape_cast %228 : vector<1x8x256xf32> to vector<8x256xf32>
    %230 = arith.mulf %227, %229 : vector<8x256xf32>
    %231 = arith.addf %211, %230 : vector<8x256xf32>
    %c32_i32 = arith.constant 32 : i32
    %232 = tpu.dynamic_rotate %177 by %c32_i32 dim 1 : vector<8x256xf32>, i32 -> vector<8x256xf32>
    %c10 = arith.constant 10 : index
    %c0_111 = arith.constant 0 : index
    %c0_112 = arith.constant 0 : index
    %233 = vector.load %arg1[%c10, %c0_111, %c0_112] : memref<49x8x256xf32, #tpu.memory_space<vmem>>, vector<1x8x256xf32>
    %234 = vector.shape_cast %233 : vector<1x8x256xf32> to vector<8x256xf32>
    %235 = arith.mulf %232, %234 : vector<8x256xf32>
    %236 = arith.addf %216, %235 : vector<8x256xf32>
    %c31_i32 = arith.constant 31 : i32
    %237 = tpu.dynamic_rotate %177 by %c31_i32 dim 1 : vector<8x256xf32>, i32 -> vector<8x256xf32>
    %c11 = arith.constant 11 : index
    %c0_113 = arith.constant 0 : index
    %c0_114 = arith.constant 0 : index
    %238 = vector.load %arg1[%c11, %c0_113, %c0_114] : memref<49x8x256xf32, #tpu.memory_space<vmem>>, vector<1x8x256xf32>
    %239 = vector.shape_cast %238 : vector<1x8x256xf32> to vector<8x256xf32>
    %240 = arith.mulf %237, %239 : vector<8x256xf32>
    %241 = arith.addf %221, %240 : vector<8x256xf32>
    %c30_i32 = arith.constant 30 : i32
    %242 = tpu.dynamic_rotate %177 by %c30_i32 dim 1 : vector<8x256xf32>, i32 -> vector<8x256xf32>
    %c12 = arith.constant 12 : index
    %c0_115 = arith.constant 0 : index
    %c0_116 = arith.constant 0 : index
    %243 = vector.load %arg1[%c12, %c0_115, %c0_116] : memref<49x8x256xf32, #tpu.memory_space<vmem>>, vector<1x8x256xf32>
    %244 = vector.shape_cast %243 : vector<1x8x256xf32> to vector<8x256xf32>
    %245 = arith.mulf %242, %244 : vector<8x256xf32>
    %246 = arith.addf %226, %245 : vector<8x256xf32>
    %c29_i32 = arith.constant 29 : i32
    %247 = tpu.dynamic_rotate %177 by %c29_i32 dim 1 : vector<8x256xf32>, i32 -> vector<8x256xf32>
    %c13 = arith.constant 13 : index
    %c0_117 = arith.constant 0 : index
    %c0_118 = arith.constant 0 : index
    %248 = vector.load %arg1[%c13, %c0_117, %c0_118] : memref<49x8x256xf32, #tpu.memory_space<vmem>>, vector<1x8x256xf32>
    %249 = vector.shape_cast %248 : vector<1x8x256xf32> to vector<8x256xf32>
    %250 = arith.mulf %247, %249 : vector<8x256xf32>
    %251 = arith.addf %231, %250 : vector<8x256xf32>
    %c19_i32 = arith.constant 19 : i32
    %252 = tpu.dynamic_rotate %177 by %c19_i32 dim 1 : vector<8x256xf32>, i32 -> vector<8x256xf32>
    %c14 = arith.constant 14 : index
    %c0_119 = arith.constant 0 : index
    %c0_120 = arith.constant 0 : index
    %253 = vector.load %arg1[%c14, %c0_119, %c0_120] : memref<49x8x256xf32, #tpu.memory_space<vmem>>, vector<1x8x256xf32>
    %254 = vector.shape_cast %253 : vector<1x8x256xf32> to vector<8x256xf32>
    %255 = arith.mulf %252, %254 : vector<8x256xf32>
    %256 = arith.addf %236, %255 : vector<8x256xf32>
    %c18_i32 = arith.constant 18 : i32
    %257 = tpu.dynamic_rotate %177 by %c18_i32 dim 1 : vector<8x256xf32>, i32 -> vector<8x256xf32>
    %c15 = arith.constant 15 : index
    %c0_121 = arith.constant 0 : index
    %c0_122 = arith.constant 0 : index
    %258 = vector.load %arg1[%c15, %c0_121, %c0_122] : memref<49x8x256xf32, #tpu.memory_space<vmem>>, vector<1x8x256xf32>
    %259 = vector.shape_cast %258 : vector<1x8x256xf32> to vector<8x256xf32>
    %260 = arith.mulf %257, %259 : vector<8x256xf32>
    %261 = arith.addf %241, %260 : vector<8x256xf32>
    %c17_i32 = arith.constant 17 : i32
    %262 = tpu.dynamic_rotate %177 by %c17_i32 dim 1 : vector<8x256xf32>, i32 -> vector<8x256xf32>
    %c16 = arith.constant 16 : index
    %c0_123 = arith.constant 0 : index
    %c0_124 = arith.constant 0 : index
    %263 = vector.load %arg1[%c16, %c0_123, %c0_124] : memref<49x8x256xf32, #tpu.memory_space<vmem>>, vector<1x8x256xf32>
    %264 = vector.shape_cast %263 : vector<1x8x256xf32> to vector<8x256xf32>
    %265 = arith.mulf %262, %264 : vector<8x256xf32>
    %266 = arith.addf %246, %265 : vector<8x256xf32>
    %c16_i32 = arith.constant 16 : i32
    %267 = tpu.dynamic_rotate %177 by %c16_i32 dim 1 : vector<8x256xf32>, i32 -> vector<8x256xf32>
    %c17 = arith.constant 17 : index
    %c0_125 = arith.constant 0 : index
    %c0_126 = arith.constant 0 : index
    %268 = vector.load %arg1[%c17, %c0_125, %c0_126] : memref<49x8x256xf32, #tpu.memory_space<vmem>>, vector<1x8x256xf32>
    %269 = vector.shape_cast %268 : vector<1x8x256xf32> to vector<8x256xf32>
    %270 = arith.mulf %267, %269 : vector<8x256xf32>
    %271 = arith.addf %251, %270 : vector<8x256xf32>
    %c15_i32 = arith.constant 15 : i32
    %272 = tpu.dynamic_rotate %177 by %c15_i32 dim 1 : vector<8x256xf32>, i32 -> vector<8x256xf32>
    %c18 = arith.constant 18 : index
    %c0_127 = arith.constant 0 : index
    %c0_128 = arith.constant 0 : index
    %273 = vector.load %arg1[%c18, %c0_127, %c0_128] : memref<49x8x256xf32, #tpu.memory_space<vmem>>, vector<1x8x256xf32>
    %274 = vector.shape_cast %273 : vector<1x8x256xf32> to vector<8x256xf32>
    %275 = arith.mulf %272, %274 : vector<8x256xf32>
    %276 = arith.addf %256, %275 : vector<8x256xf32>
    %c14_i32 = arith.constant 14 : i32
    %277 = tpu.dynamic_rotate %177 by %c14_i32 dim 1 : vector<8x256xf32>, i32 -> vector<8x256xf32>
    %c19 = arith.constant 19 : index
    %c0_129 = arith.constant 0 : index
    %c0_130 = arith.constant 0 : index
    %278 = vector.load %arg1[%c19, %c0_129, %c0_130] : memref<49x8x256xf32, #tpu.memory_space<vmem>>, vector<1x8x256xf32>
    %279 = vector.shape_cast %278 : vector<1x8x256xf32> to vector<8x256xf32>
    %280 = arith.mulf %277, %279 : vector<8x256xf32>
    %281 = arith.addf %261, %280 : vector<8x256xf32>
    %c13_i32 = arith.constant 13 : i32
    %282 = tpu.dynamic_rotate %177 by %c13_i32 dim 1 : vector<8x256xf32>, i32 -> vector<8x256xf32>
    %c20 = arith.constant 20 : index
    %c0_131 = arith.constant 0 : index
    %c0_132 = arith.constant 0 : index
    %283 = vector.load %arg1[%c20, %c0_131, %c0_132] : memref<49x8x256xf32, #tpu.memory_space<vmem>>, vector<1x8x256xf32>
    %284 = vector.shape_cast %283 : vector<1x8x256xf32> to vector<8x256xf32>
    %285 = arith.mulf %282, %284 : vector<8x256xf32>
    %286 = arith.addf %266, %285 : vector<8x256xf32>
    %c3_i32 = arith.constant 3 : i32
    %287 = tpu.dynamic_rotate %177 by %c3_i32 dim 1 : vector<8x256xf32>, i32 -> vector<8x256xf32>
    %c21 = arith.constant 21 : index
    %c0_133 = arith.constant 0 : index
    %c0_134 = arith.constant 0 : index
    %288 = vector.load %arg1[%c21, %c0_133, %c0_134] : memref<49x8x256xf32, #tpu.memory_space<vmem>>, vector<1x8x256xf32>
    %289 = vector.shape_cast %288 : vector<1x8x256xf32> to vector<8x256xf32>
    %290 = arith.mulf %287, %289 : vector<8x256xf32>
    %291 = arith.addf %271, %290 : vector<8x256xf32>
    %c2_i32 = arith.constant 2 : i32
    %292 = tpu.dynamic_rotate %177 by %c2_i32 dim 1 : vector<8x256xf32>, i32 -> vector<8x256xf32>
    %c22 = arith.constant 22 : index
    %c0_135 = arith.constant 0 : index
    %c0_136 = arith.constant 0 : index
    %293 = vector.load %arg1[%c22, %c0_135, %c0_136] : memref<49x8x256xf32, #tpu.memory_space<vmem>>, vector<1x8x256xf32>
    %294 = vector.shape_cast %293 : vector<1x8x256xf32> to vector<8x256xf32>
    %295 = arith.mulf %292, %294 : vector<8x256xf32>
    %296 = arith.addf %276, %295 : vector<8x256xf32>
    %c1_i32 = arith.constant 1 : i32
    %297 = tpu.dynamic_rotate %177 by %c1_i32 dim 1 : vector<8x256xf32>, i32 -> vector<8x256xf32>
    %c23 = arith.constant 23 : index
    %c0_137 = arith.constant 0 : index
    %c0_138 = arith.constant 0 : index
    %298 = vector.load %arg1[%c23, %c0_137, %c0_138] : memref<49x8x256xf32, #tpu.memory_space<vmem>>, vector<1x8x256xf32>
    %299 = vector.shape_cast %298 : vector<1x8x256xf32> to vector<8x256xf32>
    %300 = arith.mulf %297, %299 : vector<8x256xf32>
    %301 = arith.addf %281, %300 : vector<8x256xf32>
    %c0_i32 = arith.constant 0 : i32
    %302 = tpu.dynamic_rotate %177 by %c0_i32 dim 1 : vector<8x256xf32>, i32 -> vector<8x256xf32>
    %c24 = arith.constant 24 : index
    %c0_139 = arith.constant 0 : index
    %c0_140 = arith.constant 0 : index
    %303 = vector.load %arg1[%c24, %c0_139, %c0_140] : memref<49x8x256xf32, #tpu.memory_space<vmem>>, vector<1x8x256xf32>
    %304 = vector.shape_cast %303 : vector<1x8x256xf32> to vector<8x256xf32>
    %305 = arith.mulf %302, %304 : vector<8x256xf32>
    %306 = arith.addf %286, %305 : vector<8x256xf32>
    %c255_i32 = arith.constant 255 : i32
    %307 = tpu.dynamic_rotate %177 by %c255_i32 dim 1 : vector<8x256xf32>, i32 -> vector<8x256xf32>
    %c25 = arith.constant 25 : index
    %c0_141 = arith.constant 0 : index
    %c0_142 = arith.constant 0 : index
    %308 = vector.load %arg1[%c25, %c0_141, %c0_142] : memref<49x8x256xf32, #tpu.memory_space<vmem>>, vector<1x8x256xf32>
    %309 = vector.shape_cast %308 : vector<1x8x256xf32> to vector<8x256xf32>
    %310 = arith.mulf %307, %309 : vector<8x256xf32>
    %311 = arith.addf %291, %310 : vector<8x256xf32>
    %c254_i32 = arith.constant 254 : i32
    %312 = tpu.dynamic_rotate %177 by %c254_i32 dim 1 : vector<8x256xf32>, i32 -> vector<8x256xf32>
    %c26 = arith.constant 26 : index
    %c0_143 = arith.constant 0 : index
    %c0_144 = arith.constant 0 : index
    %313 = vector.load %arg1[%c26, %c0_143, %c0_144] : memref<49x8x256xf32, #tpu.memory_space<vmem>>, vector<1x8x256xf32>
    %314 = vector.shape_cast %313 : vector<1x8x256xf32> to vector<8x256xf32>
    %315 = arith.mulf %312, %314 : vector<8x256xf32>
    %316 = arith.addf %296, %315 : vector<8x256xf32>
    %c253_i32 = arith.constant 253 : i32
    %317 = tpu.dynamic_rotate %177 by %c253_i32 dim 1 : vector<8x256xf32>, i32 -> vector<8x256xf32>
    %c27 = arith.constant 27 : index
    %c0_145 = arith.constant 0 : index
    %c0_146 = arith.constant 0 : index
    %318 = vector.load %arg1[%c27, %c0_145, %c0_146] : memref<49x8x256xf32, #tpu.memory_space<vmem>>, vector<1x8x256xf32>
    %319 = vector.shape_cast %318 : vector<1x8x256xf32> to vector<8x256xf32>
    %320 = arith.mulf %317, %319 : vector<8x256xf32>
    %321 = arith.addf %301, %320 : vector<8x256xf32>
    %c243_i32 = arith.constant 243 : i32
    %322 = tpu.dynamic_rotate %177 by %c243_i32 dim 1 : vector<8x256xf32>, i32 -> vector<8x256xf32>
    %c28 = arith.constant 28 : index
    %c0_147 = arith.constant 0 : index
    %c0_148 = arith.constant 0 : index
    %323 = vector.load %arg1[%c28, %c0_147, %c0_148] : memref<49x8x256xf32, #tpu.memory_space<vmem>>, vector<1x8x256xf32>
    %324 = vector.shape_cast %323 : vector<1x8x256xf32> to vector<8x256xf32>
    %325 = arith.mulf %322, %324 : vector<8x256xf32>
    %326 = arith.addf %306, %325 : vector<8x256xf32>
    %c242_i32 = arith.constant 242 : i32
    %327 = tpu.dynamic_rotate %177 by %c242_i32 dim 1 : vector<8x256xf32>, i32 -> vector<8x256xf32>
    %c29 = arith.constant 29 : index
    %c0_149 = arith.constant 0 : index
    %c0_150 = arith.constant 0 : index
    %328 = vector.load %arg1[%c29, %c0_149, %c0_150] : memref<49x8x256xf32, #tpu.memory_space<vmem>>, vector<1x8x256xf32>
    %329 = vector.shape_cast %328 : vector<1x8x256xf32> to vector<8x256xf32>
    %330 = arith.mulf %327, %329 : vector<8x256xf32>
    %331 = arith.addf %311, %330 : vector<8x256xf32>
    %c241_i32 = arith.constant 241 : i32
    %332 = tpu.dynamic_rotate %177 by %c241_i32 dim 1 : vector<8x256xf32>, i32 -> vector<8x256xf32>
    %c30 = arith.constant 30 : index
    %c0_151 = arith.constant 0 : index
    %c0_152 = arith.constant 0 : index
    %333 = vector.load %arg1[%c30, %c0_151, %c0_152] : memref<49x8x256xf32, #tpu.memory_space<vmem>>, vector<1x8x256xf32>
    %334 = vector.shape_cast %333 : vector<1x8x256xf32> to vector<8x256xf32>
    %335 = arith.mulf %332, %334 : vector<8x256xf32>
    %336 = arith.addf %316, %335 : vector<8x256xf32>
    %c240_i32 = arith.constant 240 : i32
    %337 = tpu.dynamic_rotate %177 by %c240_i32 dim 1 : vector<8x256xf32>, i32 -> vector<8x256xf32>
    %c31 = arith.constant 31 : index
    %c0_153 = arith.constant 0 : index
    %c0_154 = arith.constant 0 : index
    %338 = vector.load %arg1[%c31, %c0_153, %c0_154] : memref<49x8x256xf32, #tpu.memory_space<vmem>>, vector<1x8x256xf32>
    %339 = vector.shape_cast %338 : vector<1x8x256xf32> to vector<8x256xf32>
    %340 = arith.mulf %337, %339 : vector<8x256xf32>
    %341 = arith.addf %321, %340 : vector<8x256xf32>
    %c239_i32 = arith.constant 239 : i32
    %342 = tpu.dynamic_rotate %177 by %c239_i32 dim 1 : vector<8x256xf32>, i32 -> vector<8x256xf32>
    %c32 = arith.constant 32 : index
    %c0_155 = arith.constant 0 : index
    %c0_156 = arith.constant 0 : index
    %343 = vector.load %arg1[%c32, %c0_155, %c0_156] : memref<49x8x256xf32, #tpu.memory_space<vmem>>, vector<1x8x256xf32>
    %344 = vector.shape_cast %343 : vector<1x8x256xf32> to vector<8x256xf32>
    %345 = arith.mulf %342, %344 : vector<8x256xf32>
    %346 = arith.addf %326, %345 : vector<8x256xf32>
    %c238_i32 = arith.constant 238 : i32
    %347 = tpu.dynamic_rotate %177 by %c238_i32 dim 1 : vector<8x256xf32>, i32 -> vector<8x256xf32>
    %c33 = arith.constant 33 : index
    %c0_157 = arith.constant 0 : index
    %c0_158 = arith.constant 0 : index
    %348 = vector.load %arg1[%c33, %c0_157, %c0_158] : memref<49x8x256xf32, #tpu.memory_space<vmem>>, vector<1x8x256xf32>
    %349 = vector.shape_cast %348 : vector<1x8x256xf32> to vector<8x256xf32>
    %350 = arith.mulf %347, %349 : vector<8x256xf32>
    %351 = arith.addf %331, %350 : vector<8x256xf32>
    %c237_i32 = arith.constant 237 : i32
    %352 = tpu.dynamic_rotate %177 by %c237_i32 dim 1 : vector<8x256xf32>, i32 -> vector<8x256xf32>
    %c34 = arith.constant 34 : index
    %c0_159 = arith.constant 0 : index
    %c0_160 = arith.constant 0 : index
    %353 = vector.load %arg1[%c34, %c0_159, %c0_160] : memref<49x8x256xf32, #tpu.memory_space<vmem>>, vector<1x8x256xf32>
    %354 = vector.shape_cast %353 : vector<1x8x256xf32> to vector<8x256xf32>
    %355 = arith.mulf %352, %354 : vector<8x256xf32>
    %356 = arith.addf %336, %355 : vector<8x256xf32>
    %c227_i32 = arith.constant 227 : i32
    %357 = tpu.dynamic_rotate %177 by %c227_i32 dim 1 : vector<8x256xf32>, i32 -> vector<8x256xf32>
    %c35 = arith.constant 35 : index
    %c0_161 = arith.constant 0 : index
    %c0_162 = arith.constant 0 : index
    %358 = vector.load %arg1[%c35, %c0_161, %c0_162] : memref<49x8x256xf32, #tpu.memory_space<vmem>>, vector<1x8x256xf32>
    %359 = vector.shape_cast %358 : vector<1x8x256xf32> to vector<8x256xf32>
    %360 = arith.mulf %357, %359 : vector<8x256xf32>
    %361 = arith.addf %341, %360 : vector<8x256xf32>
    %c226_i32 = arith.constant 226 : i32
    %362 = tpu.dynamic_rotate %177 by %c226_i32 dim 1 : vector<8x256xf32>, i32 -> vector<8x256xf32>
    %c36 = arith.constant 36 : index
    %c0_163 = arith.constant 0 : index
    %c0_164 = arith.constant 0 : index
    %363 = vector.load %arg1[%c36, %c0_163, %c0_164] : memref<49x8x256xf32, #tpu.memory_space<vmem>>, vector<1x8x256xf32>
    %364 = vector.shape_cast %363 : vector<1x8x256xf32> to vector<8x256xf32>
    %365 = arith.mulf %362, %364 : vector<8x256xf32>
    %366 = arith.addf %346, %365 : vector<8x256xf32>
    %c225_i32 = arith.constant 225 : i32
    %367 = tpu.dynamic_rotate %177 by %c225_i32 dim 1 : vector<8x256xf32>, i32 -> vector<8x256xf32>
    %c37 = arith.constant 37 : index
    %c0_165 = arith.constant 0 : index
    %c0_166 = arith.constant 0 : index
    %368 = vector.load %arg1[%c37, %c0_165, %c0_166] : memref<49x8x256xf32, #tpu.memory_space<vmem>>, vector<1x8x256xf32>
    %369 = vector.shape_cast %368 : vector<1x8x256xf32> to vector<8x256xf32>
    %370 = arith.mulf %367, %369 : vector<8x256xf32>
    %371 = arith.addf %351, %370 : vector<8x256xf32>
    %c224_i32 = arith.constant 224 : i32
    %372 = tpu.dynamic_rotate %177 by %c224_i32 dim 1 : vector<8x256xf32>, i32 -> vector<8x256xf32>
    %c38 = arith.constant 38 : index
    %c0_167 = arith.constant 0 : index
    %c0_168 = arith.constant 0 : index
    %373 = vector.load %arg1[%c38, %c0_167, %c0_168] : memref<49x8x256xf32, #tpu.memory_space<vmem>>, vector<1x8x256xf32>
    %374 = vector.shape_cast %373 : vector<1x8x256xf32> to vector<8x256xf32>
    %375 = arith.mulf %372, %374 : vector<8x256xf32>
    %376 = arith.addf %356, %375 : vector<8x256xf32>
    %c223_i32 = arith.constant 223 : i32
    %377 = tpu.dynamic_rotate %177 by %c223_i32 dim 1 : vector<8x256xf32>, i32 -> vector<8x256xf32>
    %c39 = arith.constant 39 : index
    %c0_169 = arith.constant 0 : index
    %c0_170 = arith.constant 0 : index
    %378 = vector.load %arg1[%c39, %c0_169, %c0_170] : memref<49x8x256xf32, #tpu.memory_space<vmem>>, vector<1x8x256xf32>
    %379 = vector.shape_cast %378 : vector<1x8x256xf32> to vector<8x256xf32>
    %380 = arith.mulf %377, %379 : vector<8x256xf32>
    %381 = arith.addf %361, %380 : vector<8x256xf32>
    %c222_i32 = arith.constant 222 : i32
    %382 = tpu.dynamic_rotate %177 by %c222_i32 dim 1 : vector<8x256xf32>, i32 -> vector<8x256xf32>
    %c40 = arith.constant 40 : index
    %c0_171 = arith.constant 0 : index
    %c0_172 = arith.constant 0 : index
    %383 = vector.load %arg1[%c40, %c0_171, %c0_172] : memref<49x8x256xf32, #tpu.memory_space<vmem>>, vector<1x8x256xf32>
    %384 = vector.shape_cast %383 : vector<1x8x256xf32> to vector<8x256xf32>
    %385 = arith.mulf %382, %384 : vector<8x256xf32>
    %386 = arith.addf %366, %385 : vector<8x256xf32>
    %c221_i32 = arith.constant 221 : i32
    %387 = tpu.dynamic_rotate %177 by %c221_i32 dim 1 : vector<8x256xf32>, i32 -> vector<8x256xf32>
    %c41 = arith.constant 41 : index
    %c0_173 = arith.constant 0 : index
    %c0_174 = arith.constant 0 : index
    %388 = vector.load %arg1[%c41, %c0_173, %c0_174] : memref<49x8x256xf32, #tpu.memory_space<vmem>>, vector<1x8x256xf32>
    %389 = vector.shape_cast %388 : vector<1x8x256xf32> to vector<8x256xf32>
    %390 = arith.mulf %387, %389 : vector<8x256xf32>
    %391 = arith.addf %371, %390 : vector<8x256xf32>
    %c211_i32 = arith.constant 211 : i32
    %392 = tpu.dynamic_rotate %177 by %c211_i32 dim 1 : vector<8x256xf32>, i32 -> vector<8x256xf32>
    %c42 = arith.constant 42 : index
    %c0_175 = arith.constant 0 : index
    %c0_176 = arith.constant 0 : index
    %393 = vector.load %arg1[%c42, %c0_175, %c0_176] : memref<49x8x256xf32, #tpu.memory_space<vmem>>, vector<1x8x256xf32>
    %394 = vector.shape_cast %393 : vector<1x8x256xf32> to vector<8x256xf32>
    %395 = arith.mulf %392, %394 : vector<8x256xf32>
    %396 = arith.addf %376, %395 : vector<8x256xf32>
    %c210_i32 = arith.constant 210 : i32
    %397 = tpu.dynamic_rotate %177 by %c210_i32 dim 1 : vector<8x256xf32>, i32 -> vector<8x256xf32>
    %c43 = arith.constant 43 : index
    %c0_177 = arith.constant 0 : index
    %c0_178 = arith.constant 0 : index
    %398 = vector.load %arg1[%c43, %c0_177, %c0_178] : memref<49x8x256xf32, #tpu.memory_space<vmem>>, vector<1x8x256xf32>
    %399 = vector.shape_cast %398 : vector<1x8x256xf32> to vector<8x256xf32>
    %400 = arith.mulf %397, %399 : vector<8x256xf32>
    %401 = arith.addf %381, %400 : vector<8x256xf32>
    %c209_i32 = arith.constant 209 : i32
    %402 = tpu.dynamic_rotate %177 by %c209_i32 dim 1 : vector<8x256xf32>, i32 -> vector<8x256xf32>
    %c44 = arith.constant 44 : index
    %c0_179 = arith.constant 0 : index
    %c0_180 = arith.constant 0 : index
    %403 = vector.load %arg1[%c44, %c0_179, %c0_180] : memref<49x8x256xf32, #tpu.memory_space<vmem>>, vector<1x8x256xf32>
    %404 = vector.shape_cast %403 : vector<1x8x256xf32> to vector<8x256xf32>
    %405 = arith.mulf %402, %404 : vector<8x256xf32>
    %406 = arith.addf %386, %405 : vector<8x256xf32>
    %c208_i32 = arith.constant 208 : i32
    %407 = tpu.dynamic_rotate %177 by %c208_i32 dim 1 : vector<8x256xf32>, i32 -> vector<8x256xf32>
    %c45 = arith.constant 45 : index
    %c0_181 = arith.constant 0 : index
    %c0_182 = arith.constant 0 : index
    %408 = vector.load %arg1[%c45, %c0_181, %c0_182] : memref<49x8x256xf32, #tpu.memory_space<vmem>>, vector<1x8x256xf32>
    %409 = vector.shape_cast %408 : vector<1x8x256xf32> to vector<8x256xf32>
    %410 = arith.mulf %407, %409 : vector<8x256xf32>
    %411 = arith.addf %391, %410 : vector<8x256xf32>
    %c207_i32 = arith.constant 207 : i32
    %412 = tpu.dynamic_rotate %177 by %c207_i32 dim 1 : vector<8x256xf32>, i32 -> vector<8x256xf32>
    %c46 = arith.constant 46 : index
    %c0_183 = arith.constant 0 : index
    %c0_184 = arith.constant 0 : index
    %413 = vector.load %arg1[%c46, %c0_183, %c0_184] : memref<49x8x256xf32, #tpu.memory_space<vmem>>, vector<1x8x256xf32>
    %414 = vector.shape_cast %413 : vector<1x8x256xf32> to vector<8x256xf32>
    %415 = arith.mulf %412, %414 : vector<8x256xf32>
    %416 = arith.addf %396, %415 : vector<8x256xf32>
    %c206_i32 = arith.constant 206 : i32
    %417 = tpu.dynamic_rotate %177 by %c206_i32 dim 1 : vector<8x256xf32>, i32 -> vector<8x256xf32>
    %c47 = arith.constant 47 : index
    %c0_185 = arith.constant 0 : index
    %c0_186 = arith.constant 0 : index
    %418 = vector.load %arg1[%c47, %c0_185, %c0_186] : memref<49x8x256xf32, #tpu.memory_space<vmem>>, vector<1x8x256xf32>
    %419 = vector.shape_cast %418 : vector<1x8x256xf32> to vector<8x256xf32>
    %420 = arith.mulf %417, %419 : vector<8x256xf32>
    %421 = arith.addf %401, %420 : vector<8x256xf32>
    %c205_i32 = arith.constant 205 : i32
    %422 = tpu.dynamic_rotate %177 by %c205_i32 dim 1 : vector<8x256xf32>, i32 -> vector<8x256xf32>
    %c48 = arith.constant 48 : index
    %c0_187 = arith.constant 0 : index
    %c0_188 = arith.constant 0 : index
    %423 = vector.load %arg1[%c48, %c0_187, %c0_188] : memref<49x8x256xf32, #tpu.memory_space<vmem>>, vector<1x8x256xf32>
    %424 = vector.shape_cast %423 : vector<1x8x256xf32> to vector<8x256xf32>
    %425 = arith.mulf %422, %424 : vector<8x256xf32>
    %426 = arith.addf %406, %425 : vector<8x256xf32>
    %427 = arith.addf %426, %411 : vector<8x256xf32>
    %428 = arith.addf %416, %421 : vector<8x256xf32>
    %429 = arith.addf %427, %428 : vector<8x256xf32>
    %430 = vector.extract_strided_slice %429 {offsets = [0, 0], sizes = [4, 256], strides = [1, 1]} : vector<8x256xf32> to vector<4x256xf32>
    %431 = vector.extract_strided_slice %429 {offsets = [4, 0], sizes = [4, 256], strides = [1, 1]} : vector<8x256xf32> to vector<4x256xf32>
    %432 = arith.addf %430, %431 : vector<4x256xf32>
    %cst_189 = arith.constant 0.000000e+00 : f32
    %433 = vector.broadcast %cst_189 : f32 to vector<4x256xf32>
    %434 = arith.subf %433, %432 : vector<4x256xf32>
    %435 = math.exp %434 : vector<4x256xf32>
    %cst_190 = arith.constant 1.000000e+00 : f32
    %436 = vector.broadcast %cst_190 : f32 to vector<4x256xf32>
    %437 = arith.addf %436, %435 : vector<4x256xf32>
    %cst_191 = arith.constant 1.000000e+00 : f32
    %438 = vector.broadcast %cst_191 : f32 to vector<4x256xf32>
    %439 = arith.divf %438, %437 : vector<4x256xf32>
    %440 = vector.extract_strided_slice %439 {offsets = [0, 0], sizes = [1, 256], strides = [1, 1]} : vector<4x256xf32> to vector<1x256xf32>
    %441 = vector.broadcast %440 : vector<1x256xf32> to vector<4x256xf32>
    %442 = arith.mulf %441, %39 : vector<4x256xf32>
    %c0_192 = arith.constant 0 : index
    %c0_193 = arith.constant 0 : index
    %c0_194 = arith.constant 0 : index
    %443 = vector.load %arg8[%c0_192, %c0_193, %c0_194] : memref<4x4x256xf32, #tpu.memory_space<vmem>>, vector<1x4x256xf32>
    %444 = vector.shape_cast %443 : vector<1x4x256xf32> to vector<4x256xf32>
    %445 = vector.shape_cast %442 : vector<4x256xf32> to vector<1x4x256xf32>
    tpu.vector_store %arg8[%c0_192, %c0_193, %c0_194], %445 {strides = array<i32>} : memref<4x4x256xf32, #tpu.memory_space<vmem>>, vector<1x4x256xf32>,
    %446 = vector.extract_strided_slice %439 {offsets = [1, 0], sizes = [1, 256], strides = [1, 1]} : vector<4x256xf32> to vector<1x256xf32>
    %447 = vector.broadcast %446 : vector<1x256xf32> to vector<4x256xf32>
    %448 = arith.mulf %447, %82 : vector<4x256xf32>
    %c1_195 = arith.constant 1 : index
    %c0_196 = arith.constant 0 : index
    %c0_197 = arith.constant 0 : index
    %449 = vector.load %arg8[%c1_195, %c0_196, %c0_197] : memref<4x4x256xf32, #tpu.memory_space<vmem>>, vector<1x4x256xf32>
    %450 = vector.shape_cast %449 : vector<1x4x256xf32> to vector<4x256xf32>
    %451 = vector.shape_cast %448 : vector<4x256xf32> to vector<1x4x256xf32>
    tpu.vector_store %arg8[%c1_195, %c0_196, %c0_197], %451 {strides = array<i32>} : memref<4x4x256xf32, #tpu.memory_space<vmem>>, vector<1x4x256xf32>,
    %452 = vector.extract_strided_slice %439 {offsets = [2, 0], sizes = [1, 256], strides = [1, 1]} : vector<4x256xf32> to vector<1x256xf32>
    %453 = vector.broadcast %452 : vector<1x256xf32> to vector<4x256xf32>
    %454 = arith.mulf %453, %125 : vector<4x256xf32>
    %c2_198 = arith.constant 2 : index
    %c0_199 = arith.constant 0 : index
    %c0_200 = arith.constant 0 : index
    %455 = vector.load %arg8[%c2_198, %c0_199, %c0_200] : memref<4x4x256xf32, #tpu.memory_space<vmem>>, vector<1x4x256xf32>
    %456 = vector.shape_cast %455 : vector<1x4x256xf32> to vector<4x256xf32>
    %457 = vector.shape_cast %454 : vector<4x256xf32> to vector<1x4x256xf32>
    tpu.vector_store %arg8[%c2_198, %c0_199, %c0_200], %457 {strides = array<i32>} : memref<4x4x256xf32, #tpu.memory_space<vmem>>, vector<1x4x256xf32>,
    %458 = vector.extract_strided_slice %439 {offsets = [3, 0], sizes = [1, 256], strides = [1, 1]} : vector<4x256xf32> to vector<1x256xf32>
    %459 = vector.broadcast %458 : vector<1x256xf32> to vector<4x256xf32>
    %460 = arith.mulf %459, %168 : vector<4x256xf32>
    %c3_201 = arith.constant 3 : index
    %c0_202 = arith.constant 0 : index
    %c0_203 = arith.constant 0 : index
    %461 = vector.load %arg8[%c3_201, %c0_202, %c0_203] : memref<4x4x256xf32, #tpu.memory_space<vmem>>, vector<1x4x256xf32>
    %462 = vector.shape_cast %461 : vector<1x4x256xf32> to vector<4x256xf32>
    %463 = vector.shape_cast %460 : vector<4x256xf32> to vector<1x4x256xf32>
    tpu.vector_store %arg8[%c3_201, %c0_202, %c0_203], %463 {strides = array<i32>} : memref<4x4x256xf32, #tpu.memory_space<vmem>>, vector<1x4x256xf32>,
    return
  }
  func.func @transform_0(%arg0: i32) -> (i32, i32, i32) {
    %c0_i32 = arith.constant 0 : i32
    %c0_i32_0 = arith.constant 0 : i32
    %c0_i32_1 = arith.constant 0 : i32
    %c0_i32_2 = arith.constant 0 : i32
    return %c0_i32, %c0_i32_0, %c0_i32_1 : i32, i32, i32
  }
  func.func @transform_1(%arg0: i32) -> (i32, i32) {
    %c0_i32 = arith.constant 0 : i32
    %c0_i32_0 = arith.constant 0 : i32
    %c0_i32_1 = arith.constant 0 : i32
    return %c0_i32, %c0_i32_0 : i32, i32
  }
  func.func @transform_2(%arg0: i32) -> (i32, i32) {
    %c0_i32 = arith.constant 0 : i32
    %c0_i32_0 = arith.constant 0 : i32
    %c0_i32_1 = arith.constant 0 : i32
    return %c0_i32, %c0_i32_0 : i32, i32
  }
  func.func @transform_3(%arg0: i32) -> (i32, i32) {
    %c0_i32 = arith.constant 0 : i32
    %c0_i32_0 = arith.constant 0 : i32
    %c0_i32_1 = arith.constant 0 : i32
    return %c0_i32, %c0_i32_0 : i32, i32
  }
  func.func @transform_4(%arg0: i32) -> (i32, i32) {
    %c0_i32 = arith.constant 0 : i32
    %c0_i32_0 = arith.constant 0 : i32
    %c0_i32_1 = arith.constant 0 : i32
    return %c0_i32, %c0_i32_0 : i32, i32
  }
  func.func @transform_5(%arg0: i32) -> (i32, i32) {
    %c0_i32 = arith.constant 0 : i32
    %c0_i32_0 = arith.constant 0 : i32
    %c0_i32_1 = arith.constant 0 : i32
    return %c0_i32, %c0_i32_0 : i32, i32
  }
  func.func @transform_6(%arg0: i32) -> (i32, i32, i32) {
    %c0_i32 = arith.constant 0 : i32
    %c0_i32_0 = arith.constant 0 : i32
    %c0_i32_1 = arith.constant 0 : i32
    return %arg0, %c0_i32, %c0_i32_0 : i32, i32, i32
  }
  func.func @transform_7(%arg0: i32) -> (i32, i32, i32) {
    %c0_i32 = arith.constant 0 : i32
    %c0_i32_0 = arith.constant 0 : i32
    %c0_i32_1 = arith.constant 0 : i32
    return %arg0, %c0_i32, %c0_i32_0 : i32, i32, i32
  }
}

</mosaic_0001>

<bundles_post_ra>
// kernel: tpu_custom_call.1
= control target key start
LH: loop header
LB: loop body
LE: loop exit
PB: predicated region body
PF: predicated region fallthrough
CT: control target
= control target key end

     0   :  { %12 = vsyncpa [#allocation4], 0  ;;  %s2893_s0 = inlined_call_operand.hbm [shape: f32[49,8,256], index: 0, kind: input, shape index: {}]   ;;  %s2894_s1 = inlined_call_operand.vmem [shape: f32[4,4], index: 1, kind: input, shape index: {}]   ;;  %s2895_s2 = inlined_call_operand.vmem [shape: f32[4,4], index: 2, kind: input, shape index: {}]   ;;  %s2896_s3 = inlined_call_operand.vmem [shape: f32[1,4], index: 3, kind: input, shape index: {}]   ;;  %s2897_s4 = inlined_call_operand.vmem [shape: f32[8,4], index: 4, kind: input, shape index: {}]   ;;  %s2898_s5 = inlined_call_operand.vmem [shape: f32[8,1], index: 5, kind: input, shape index: {}]   ;;  %s2899_s6 = inlined_call_operand.hbm [shape: f32[8,4,256], index: 6, kind: input, shape index: {}]   ;;  %s2900_s7 = inlined_call_operand.hbm [shape: f32[8,4,256], index: 7, kind: output, shape index: {}]  }
   0x1   :  { %13 = vsyncpa [#allocation7], 0 }
   0x2   :  { %15 = vsyncpa [#allocation7 + $0x1], 0 }
   0x3   :  { %16 = vsyncpa [#allocation5], 0 }
   0x4   :  { %18 = vsyncpa [#allocation5 + $0x1], 0  ;;  %s2100_s24 = smov 0   ;;  %s2102_s25 = smov 0  }
   0x5   :  { %s2104_s26 = smov 0   ;;  %s2106_s27 = smov 0  }
   0x6 LB: > { %s2121_s28 = sadd.s32 4294967295, %s1999_s27   ;;  %s1700_s29 = sadd.s32 4294967294, %s1999_s27   ;;  %s1999_s27 = sphi %s2106_s27, %s2922_s27   ;;  %s1995_s26 = sphi %s2104_s26, %s2921_s26   ;;  %s1991_s25 = sphi %s2102_s25, %s2920_s25   ;;  %s1987_s24 = sphi %s2100_s24, %s2919_s24  }
   0x7   : > { %p170_p0 = scmp.ne.s32.totalorder %s1991_s25, %s1987_s24  ;;  %p2901_p1 = scmp.eq.s32.totalorder %s2121_s28, 0 }
   0x8   : > { %p200_p3 = scmp.eq.s32.totalorder %s1700_s29, 1  ;;  %p1701_p5 = scmp.ge.s32.totalorder %s1999_s27, 1 }
   0x9   : > { %p2130_p4 = por %p2901_p1, %p170_p0  ;;  %p207_p7 = scmp.lt.s32.totalorder %s1999_s27, 3 }
   0xa   : > { %p2135_p6 = por %p200_p3, %p170_p0  ;;  %s2001_s10 = smov [#allocation3]  }
   0xb   : > { %s2904_s30 = scalar_select %p2130_p4, 1, 0 }
   0xc   : > { %s2905_s8 = scalar_select %p2135_p6, 1, 0 }
   0xd   : > { %p2140_p8 = pnand %p1701_p5, %p207_p7  ;;  %s219_s11 = sshll.u32 %s2001_s10, 4  ;;  %s2144_s11 = int_to_ptr.vmem [resolvable:$true] %s219_s11 }
   0xe   : > { %s2156_s13 = sadd.s32 1, %s1999_s27   ;;  %s157_s14 = sadd.s32 1, %s1995_s26 }
   0xf   : > { %s2906_s9 = scalar_select %p2140_p8, 1, 0 }
  0x10   : > { %p1736_p9 = pneg %p2140_p8  ;;  %s154_s15 = ssub.s32 %s1999_s27, %s2156_s13 }
  0x11   : > { %s1871_s18 = scalar_lea.hbm %s2893_s0, 12544 }
  0x12   : > { %p2151_p11 = pnand %p1736_p9, %p2901_p1  ;;  %p1872_p12 = scmp.ne.s32.totalorder %s2893_s0, %s1871_s18 }
  0x13   : > { %p1878_p5 = scmp.lt.u32.totalorder %s1871_s18, %s2893_s0 }
  0x14   : > { %p1873_p13 = pneg %p2151_p11 }
  0x16   : > { %p1874_p0 = pnand %p1873_p13, %p1872_p12 }
  0x18   : > { %p1875_p3 = pneg %p1874_p0 }
  0x1a   : > { %p1880_p7 = pnand %p1878_p5, %p1875_p3 }
  0x1c   : > { %1883 = shalt.err (!%p1880_p7)
}
  0x1d   : > { %s1884_s23 = scalar_lea.vmem %s2144_s11, 12544  ;;  %p1892_p2 = scmp.lt.s32.totalorder %s2144_s11, %s2144_s11 }
  0x1e   : > { %p1885_p9 = scmp.ne.s32.totalorder %s2144_s11, %s1884_s23  ;;  %p1893_p6 = scmp.lt.s32.totalorder %s1884_s23, %s1884_s23 }
  0x20   : > { %p1887_p10 = pnand %p1885_p9, %p1873_p13  ;;  %p1894_p4 = por %p1893_p6, %p1892_p2 }
  0x22   : > { %p1888_p1 = pneg %p1887_p10 }
  0x24   : > { %p1895_p8 = pnand %p1894_p4, %p1888_p1 }
  0x26   : > { %1898 = shalt.err (!%p1895_p8)
}
  0x27   : > { %s2002_s29 = smov 256   ;;  %s2003_s10 = smov 16  }
  0x28   : > { %1739 = dma.hbm_to_vmem [thread:$0]  (!%p2151_p11), %s2893_s0, 12544, %s2144_s11, [#allocation4], %s2002_s29, %s2002_s29, %s2003_s10  }
  0x29   : > { %p155_p2 = scmp.eq.s32.totalorder %s154_s15, 0  ;;  %p164_p1 = scmp.ne.s32.totalorder %s1995_s26, %s1991_s25 }
  0x2a   : > { %p165_p4 = scmp.eq.s32.totalorder %s1999_s27, 0  ;;  %p1749_p6 = scmp.lt.s32.totalorder %s1999_s27, 2 }
  0x2b   : > { %s2187_s18 = scalar_select %p155_p2, %s1995_s26, %s157_s14  }
  0x2c   : > { %p166_p8 = por %p165_p4, %p164_p1  ;;  %p2908_p10 = scmp.eq.s32.totalorder %s2121_s28, 1 }
  0x2d   : > { %s248_s20 = sand.u32 1, %s1995_s26   ;;  %s1725_s21 = sshll.u32 %s1999_s27, 9 }
  0x2e   : > { %p2191_p12 = por %p2908_p10, %p164_p1  ;;  %s1704_s22 = sshll.u32 %s248_s20, 5 }
  0x2f   : > { %s2200_s16 = scalar_lea.hbm %s2899_s6, %s1725_s21  ;;  %s252_s11 = scalar_lea.vmem [#allocation6], %s1704_s22 }
  0x30   : > { %s260_s14 = sshll.u32 %s252_s11, 4  ;;  %p2202_p11 = pnand %p1749_p6, %p166_p8  ;;  %s2206_s14 = int_to_ptr.vmem [resolvable:$true] %s260_s14 }
  0x31   : > { %s2208_s29 = scalar_lea.sflag [#allocation7], %s248_s20  ;;  %s1899_s10 = scalar_lea.hbm %s2200_s16, 512 }
  0x32   : > { %p1900_p13 = scmp.ne.s32.totalorder %s2200_s16, %s1899_s10  ;;  %p1901_p0 = pneg %p2202_p11 }
  0x33   : > { %s1904_s22 = scalar_lea.hbm %s2899_s6, 1024  ;;  %p1905_p7 = scmp.lt.u32.totalorder %s2200_s16, %s2899_s6 }
  0x34   : > { %p1902_p3 = pnand %p1901_p0, %p1900_p13  ;;  %p1906_p9 = scmp.lt.u32.totalorder %s1904_s22, %s1899_s10 }
  0x35   : > { %p1908_p1 = scmp.lt.u32.totalorder %s1899_s10, %s2200_s16 }
  0x36   : > { %p1903_p5 = pneg %p1902_p3  ;;  %p1907_p2 = por %p1906_p9, %p1905_p7 }
  0x38   : > { %p1909_p4 = por %p1908_p1, %p1907_p2 }
  0x3a   : > { %p1910_p6 = pnand %p1909_p4, %p1903_p5 }
  0x3c   : > { %1913 = shalt.err (!%p1910_p6)
}
  0x3d   : > { %s1914_s20 = scalar_lea.vmem %s2206_s14, 512  ;;  %s2004_s11 = smov [#allocation6]  }
  0x3e   : > { %p1915_p8 = scmp.ne.s32.totalorder %s2206_s14, %s1914_s20  ;;  %s1919_s17 = sshll.u32 %s2004_s11, 4  ;;  %s1920_s17 = int_to_ptr.vmem [resolvable:$false] %s1919_s17 }
  0x3f   : > { %s1921_s21 = scalar_lea.vmem %s1920_s17, 1024  ;;  %p1922_p3 = scmp.lt.s32.totalorder %s2206_s14, %s1920_s17 }
  0x40   : > { %p1917_p10 = pnand %p1915_p8, %p1901_p0  ;;  %p1923_p7 = scmp.lt.s32.totalorder %s1921_s21, %s1914_s20 }
  0x42   : > { %p1918_p13 = pneg %p1917_p10  ;;  %p1924_p9 = por %p1923_p7, %p1922_p3 }
  0x44   : > { %p1925_p2 = pnand %p1924_p9, %p1918_p13 }
  0x46   : > { %1928 = shalt.err (!%p1925_p2)
}
  0x47   : > { %s2005_s10 = smov 128   ;;  %s2006_s22 = smov 8  }
  0x48   : > { %1743 = dma.hbm_to_vmem [thread:$0]  (!%p2202_p11), %s2200_s16, 512, %s2206_s14, %s2208_s29, %s2005_s10, %s2005_s10, %s2006_s22  }
  0x49   : > { %p2911_p0 = scmp.ne.s32.totalorder %s2906_s9, 0 }
  0x4a   : > { %p2912_p5 = scmp.eq.s32.totalorder (!%p2911_p0), %s2121_s28, 0 }
  0x4b   : > { %272 = sbr.rel (%p2911_p0) target bundleno = 1005 (0x3ed), region = 48 }
  0x52   : > { %1974 = dma.done.wait (%p2912_p5), [#allocation4], 12544   ;;  %p2913_p1 = pmov %p2912_p5 }
  0x53   : > { %s2243_s12 = sand.u32 1, %s1991_s25   ;;  %p2914_p11 = scmp.ne.s32.totalorder %s2904_s30, 0 }
  0x54   : > { %1976 = vsyncadd (%p2913_p1), [#allocation4], 4294954752  ;;  %s1710_s23 = sshll.u32 %s2243_s12, 5  ;;  %s279_s20 = scalar_lea.sflag [#allocation7], %s2243_s12 }
  0x55   : > { %s282_s16 = scalar_lea.vmem [#allocation6], %s1710_s23 }
  0x56   : > { %1978 = dma.done.wait (%p2914_p11), %s279_s20, 512  }
  0x57   : > { %1980 = vsyncadd (%p2914_p11), %s279_s20, 4294966784  ;;  %vm324_vm0 = vcmask 1043456   ;;  %v2253_v0 = vld [vmem:[%s282_s16 + $0x10] sm:$0xff]  ;;  %v2255_v1 = vld [vmem:[%s282_s16] sm:$0xff]  ;;  %vm339_vm1 = vcmask 27648   ;;  %vm354_vm2 = vcmask 31744  }
  0x58   : > { %v2257_v2 = vld [vmem:[%s282_s16 + $0x18] sm:$0xff]  ;;  %v2261_v3 = vcombine.high %v2253_v0, %v2253_v0  ;;  %v587_v4 = vsel %vm324_vm0, %v2253_v0, 0.0  ;;  %v2267_v5 = vcombine.high %v2255_v1, %v2255_v1  ;;  %v330_v6 = vsel %vm324_vm0, %v2255_v1, 0.0  ;;  %v2271_v7 = vld [vmem:[%s282_s16 + $0x8] sm:$0xff]  ;;  %v316_v38 = vld [vmem:[%s2895_s2] sm:$0xf] }
  0x59   : > { %v2275_v8 = vcombine.high %v2257_v2, %v2257_v2  ;;  %v2279_v9 = vcombine.high %v2271_v7, %v2271_v7  ;;  %v713_v12 = vsel %vm324_vm0, %v2257_v2, 0.0  ;;  %v461_v13 = vsel %vm324_vm0, %v2271_v7, 0.0  ;;  %v315_v39 = vld [vmem:[%s2894_s1] sm:$0xf]  ;;  %s2009_s20 = smov 49   ;;  %s2010_s16 = smov 51  }
  0x5a   : > { %v588_v10 = vsel %vm324_vm0, %v2261_v3, 0.0  ;;  %v331_v11 = vsel %vm324_vm0, %v2267_v5, 0.0  ;;  %v456_v20 = vsel %vm324_vm0, %v2271_v7, -inf  ;;  %v325_v22 = vsel %vm324_vm0, %v2255_v1, -inf  ;;  %s2011_s30 = smov 48   ;;  %s2012_s9 = smov 47  }
  0x5b   : > { %v589_v14 = vadd.f32 %v588_v10, %v587_v4  ;;  %v332_v15 = vadd.f32 %v331_v11, %v330_v6  ;;  %v714_v16 = vsel %vm324_vm0, %v2275_v8, 0.0  ;;  %v462_v17 = vsel %vm324_vm0, %v2279_v9, 0.0  ;;  %s2013_s14 = smov 50   ;;  %s2014_s15 = smov 46  }
  0x5c   : > { %v715_v18 = vadd.f32 %v714_v16, %v713_v12  ;;  %v463_v19 = vadd.f32 %v462_v17, %v461_v13  ;;  %v457_v21 = vsel %vm324_vm0, %v2279_v9, -inf  ;;  %v326_v23 = vsel %vm324_vm0, %v2267_v5, -inf  ;;  %s2015_s29 = smov 45   ;;  %s2016_s11 = smov 35  }
  0x5d   : > { %590 = vadd.xlane.f32.xlu1 %v589_v14  ;;  %333 = vadd.xlane.f32.xlu0 %v332_v15  ;;  %v458_v24 = vmax.f32 %v456_v20, %v457_v21  ;;  %v327_v25 = vmax.f32 %v325_v22, %v326_v23  ;;  %v708_v26 = vsel %vm324_vm0, %v2257_v2, -inf  ;;  %v709_v27 = vsel %vm324_vm0, %v2275_v8, -inf  ;;  %s2017_s17 = smov 34   ;;  %s2018_s21 = smov 33  }
  0x5e   : > { %v582_v28 = vsel %vm324_vm0, %v2253_v0, -inf  ;;  %v583_v29 = vsel %vm324_vm0, %v2261_v3, -inf  ;;  %v710_v30 = vmax.f32 %v708_v26, %v709_v27  ;;  %v349_v10 = vlaneseq  ;;  %s2019_s10 = smov 32   ;;  %s2020_s22 = smov 31  }
  0x5f   : > { %v584_v31 = vmax.f32 %v582_v28, %v583_v29 }
  0x60   : > { %vm2370_vm3 = vcmp.lt.s32.totalorder %v349_v10, 256 }
  0x61   : > { %716 = vadd.xlane.f32.xlu1 %v715_v18  ;;  %464 = vadd.xlane.f32.xlu0 %v463_v19  ;;  %v2320_v19 = vshrl.u32 %v349_v10, 7 }
  0x63   : > { %v2326_v29 = vsub.s32 0, %v2320_v19 }
  0x65   : > { %459 = vmax.xlane.f32.xlu1 %v458_v24  ;;  %328 = vmax.xlane.f32.xlu0 %v327_v25  ;;  %v317_v24 = vld [vmem:[%s2896_s3] sm:$0x1] }
  0x69   : > { %711 = vmax.xlane.f32.xlu1 %v710_v30  ;;  %585 = vmax.xlane.f32.xlu0 %v584_v31 }
  0xea   : > { %v591_v32 = vpop.xlane.xlu1 %590  ;;  %v334_v33 = vpop.xlane.xlu0 %333 }
  0xeb   : > { %v335_v36 = vmul.f32 0.00390625, %v334_v33  ;;  %v592_v40 = vmul.f32 0.00390625, %v591_v32 }
  0xed   : > { %v337_v44 = vmul.f32 %v335_v36, %v316_v38  ;;  %v594_v50 = vmul.f32 %v592_v40, %v316_v38 }
  0xee   : > { %v717_v34 = vpop.xlane.xlu1 %716  ;;  %v465_v35 = vpop.xlane.xlu0 %464 }
  0xef   : > { %v466_v37 = vmul.f32 0.00390625, %v465_v35  ;;  %v718_v41 = vmul.f32 0.00390625, %v717_v34 }
  0xf1   : > { %v468_v45 = vmul.f32 %v466_v37, %v316_v38  ;;  %v720_v51 = vmul.f32 %v718_v41, %v316_v38  ;;  %v318_v38 = vld [vmem:[%s2897_s4] sm:$0xff] }
  0xf2   : > { %v460_v42 = vpop.xlane.xlu1 %459  ;;  %v329_v43 = vpop.xlane.xlu0 %328 }
  0xf3   : > { %v467_v46 = vmul.f32 %v460_v42, %v315_v39  ;;  %v336_v47 = vmul.f32 %v329_v43, %v315_v39 }
  0xf5   : > { %v469_v48 = vadd.f32 %v468_v45, %v467_v46  ;;  %v338_v49 = vadd.f32 %v337_v44, %v336_v47 }
  0xf6   : > { %v712_v52 = vpop.xlane.xlu1 %711  ;;  %v586_v53 = vpop.xlane.xlu0 %585 }
  0xf7   : > { %v470_v54 = vsel %vm339_vm1, %v469_v48, 0.0  ;;  %v340_v55 = vsel %vm339_vm1, %v338_v49, 0.0  ;;  %v719_v56 = vmul.f32 %v712_v52, %v315_v39  ;;  %v593_v57 = vmul.f32 %v586_v53, %v315_v39 }
  0xf8   : > { %v471_v58 = vrot.slane %v470_v54, 4  ;;  %v341_v59 = vrot.slane %v340_v55, 4 }
  0xf9   : > { %v721_v60 = vadd.f32 %v720_v51, %v719_v56  ;;  %v595_v61 = vadd.f32 %v594_v50, %v593_v57  ;;  %v319_v56 = vld [vmem:[%s2898_s5] sm:$0xff] }
  0xfa   : > { %v472_v62 = vadd.f32 %v471_v58, %v470_v54  ;;  %v342_v63 = vadd.f32 %v341_v59, %v340_v55  ;;  %v2007_v55 = vmov 0  }
  0xfb   : > { %v722_v4 = vsel %vm339_vm1, %v721_v60, 0.0  ;;  %v596_v6 = vsel %vm339_vm1, %v595_v61, 0.0  ;;  %1842 = vset.pattern.permute.xlu1 %v2007_v55  ;;  %1841 = vset.pattern.permute.xlu0 %v2007_v55 }
  0xfc   : > { %v473_v11 = vrot.slane %v472_v62, 2  ;;  %v343_v12 = vrot.slane %v342_v63, 2  ;;  %v723_v13 = vrot.slane %v722_v4, 4  ;;  %v597_v14 = vrot.slane %v596_v6, 4 }
  0xfe   : > { %v474_v15 = vadd.f32 %v473_v11, %v472_v62  ;;  %v344_v16 = vadd.f32 %v343_v12, %v342_v63  ;;  %v724_v17 = vadd.f32 %v723_v13, %v722_v4  ;;  %v598_v18 = vadd.f32 %v597_v14, %v596_v6 }
 0x100   : > { %v475_v20 = vrot.slane %v474_v15, 1  ;;  %v345_v21 = vrot.slane %v344_v16, 1  ;;  %v725_v22 = vrot.slane %v724_v17, 2  ;;  %v599_v23 = vrot.slane %v598_v18, 2 }
 0x102   : > { %v726_v25 = vadd.f32 %v725_v22, %v724_v17  ;;  %v600_v26 = vadd.f32 %v599_v23, %v598_v18  ;;  %v476_v27 = vadd.f32 %v475_v20, %v474_v15  ;;  %v346_v28 = vadd.f32 %v345_v21, %v344_v16 }
 0x104   : > { %v727_v30 = vrot.slane %v726_v25, 1  ;;  %v601_v31 = vrot.slane %v600_v26, 1  ;;  %v477_v32 = vadd.f32 %v476_v27, %v317_v24  ;;  %v347_v33 = vadd.f32 %v346_v28, %v317_v24 }
 0x106   : > { %v478_v34 = vmax.f32 %v477_v32, 0.0  ;;  %v348_v35 = vmax.f32 %v347_v33, 0.0  ;;  %v728_v36 = vadd.f32 %v727_v30, %v726_v25  ;;  %v602_v37 = vadd.f32 %v601_v31, %v600_v26 }
 0x108   : > { %v482_v39 = vrot.slane %v478_v34, %v2326_v29  ;;  %v352_v40 = vrot.slane %v348_v35, %v2326_v29  ;;  %v729_v41 = vadd.f32 %v728_v36, %v317_v24  ;;  %v603_v42 = vadd.f32 %v602_v37, %v317_v24 }
 0x10a   : > { %v483_v43 = vmul.f32 %v482_v39, %v318_v38  ;;  %v353_v44 = vmul.f32 %v352_v40, %v318_v38  ;;  %v730_v45 = vmax.f32 %v729_v41, 0.0  ;;  %v604_v46 = vmax.f32 %v603_v42, 0.0 }
 0x10b   : > { %v2008_v40 = vmov 1966171168  }
 0x10c   : > { %v484_v47 = vsel %vm354_vm2, %v483_v43, 0.0  ;;  %v355_v48 = vsel %vm354_vm2, %v353_v44, 0.0  ;;  %v734_v49 = vrot.slane %v730_v45, %v2326_v29  ;;  %v608_v50 = vrot.slane %v604_v46, %v2326_v29 }
 0x10d   : > { %485 = vadd.xlane.f32.xlu1 %v484_v47  ;;  %356 = vadd.xlane.f32.xlu0 %v355_v48  ;;  %v394_v41 = vunpack.c.l.s4 %v2008_v40 }
 0x10e   : > { %v735_v51 = vmul.f32 %v734_v49, %v318_v38  ;;  %v609_v52 = vmul.f32 %v608_v50, %v318_v38 }
 0x10f   : > { %v395_v42 = vunpack.c.0.s8 %v394_v41 }
 0x110   : > { %v736_v53 = vsel %vm354_vm2, %v735_v51, 0.0  ;;  %v610_v54 = vsel %vm354_vm2, %v609_v52, 0.0 }
 0x111   : > { %737 = vadd.xlane.f32.xlu1 %v736_v53  ;;  %611 = vadd.xlane.f32.xlu0 %v610_v54  ;;  %v2345_v47 = vsub.s32 %v395_v42, %v2320_v19 }
 0x19a   : > { %v486_v57 = vpop.xlane.xlu1 %485  ;;  %v357_v58 = vpop.xlane.xlu0 %356 }
 0x19b   : > { %v487_v59 = vadd.f32 %v486_v57, %v319_v56  ;;  %v358_v60 = vadd.f32 %v357_v58, %v319_v56 }
 0x19d   : > { %v489_v61 = vrot.slane %v487_v59, 4  ;;  %v360_v62 = vrot.slane %v358_v60, 4 }
 0x19e   : > { %v738_v63 = vpop.xlane.xlu1 %737  ;;  %v612_v4 = vpop.xlane.xlu0 %611 }
 0x19f   : > { %v491_v6 = vadd.f32 %v489_v61, %v487_v59  ;;  %v362_v11 = vadd.f32 %v360_v62, %v358_v60  ;;  %v739_v12 = vadd.f32 %v738_v63, %v319_v56  ;;  %v613_v13 = vadd.f32 %v612_v4, %v319_v56 }
 0x1a1   : > { %v492_v14 = vsub.f32 0.0, %v491_v6  ;;  %v363_v15 = vsub.f32 0.0, %v362_v11  ;;  %v741_v16 = vrot.slane %v739_v12, 4  ;;  %v615_v17 = vrot.slane %v613_v13, 4 }
 0x1a3   : > { %v493_v18 = vmul.f32 1.442695, %v492_v14  ;;  %v364_v20 = vmul.f32 1.442695, %v363_v15  ;;  %v743_v21 = vadd.f32 %v741_v16, %v739_v12  ;;  %v617_v22 = vadd.f32 %v615_v17, %v613_v13 }
 0x1a5   : > { %1847 = vpow2.f32 %v493_v18  ;;  %v744_v23 = vsub.f32 0.0, %v743_v21  ;;  %v618_v24 = vsub.f32 0.0, %v617_v22 }
 0x1a6   : > { %1849 = vpow2.f32 %v364_v20 }
 0x1a7   : > { %v745_v25 = vmul.f32 1.442695, %v744_v23  ;;  %v619_v26 = vmul.f32 1.442695, %v618_v24 }
 0x1a9   : > { %1851 = vpow2.f32 %v745_v25 }
 0x1aa   : > { %1853 = vpow2.f32 %v619_v26 }
 0x1af   : > { %v1848_v27 = vpop.eup %1847 }
 0x1b0   : > { %v1850_v28 = vpop.eup %1849  ;;  %v495_v30 = vadd.f32 1.0, %v1848_v27 }
 0x1b1   : > { %v366_v31 = vadd.f32 1.0, %v1850_v28 }
 0x1b2   : > { %1855 = vrcp.f32 %v495_v30 }
 0x1b3   : > { %v1852_v32 = vpop.eup %1851  ;;  %1857 = vrcp.f32 %v366_v31 }
 0x1b4   : > { %v1854_v33 = vpop.eup %1853  ;;  %v747_v35 = vadd.f32 1.0, %v1852_v32 }
 0x1b5   : > { %v621_v34 = vadd.f32 1.0, %v1854_v33 }
 0x1b7   : > { %1859 = vrcp.f32 %v621_v34 }
 0x1b8   : > { %1861 = vrcp.f32 %v747_v35 }
 0x1bc   : > { %v1856_v36 = vpop.eup %1855 }
 0x1bd   : > { %v1858_v37 = vpop.eup %1857  ;;  %500 = vperm.xlu1 %1842, %v1856_v36  }
 0x1be   : > { %371 = vperm.xlu0 %1841, %v1858_v37  }
 0x1c1   : > { %v1860_v38 = vpop.eup %1859 }
 0x1c2   : > { %626 = vperm.xlu1 %1842, %v1860_v38   ;;  %v1862_v39 = vpop.eup %1861 }
 0x1c6   : > { %752 = vperm.xlu1 %1842, %v1862_v39  }
 0x23c   : > { %v501_v43 = vpop.permute.xlu1 %500 }
 0x23d   : > { %v2339_v44 = vmul.f32 %v2271_v7, %v501_v43  ;;  %v2342_v45 = vmul.f32 %v501_v43, %v2279_v9  ;;  %v372_v46 = vpop.permute.xlu0 %371 }
 0x23e   : > { %v2348_v48 = vmul.f32 %v372_v46, %v2255_v1  ;;  %v2351_v49 = vmul.f32 %v372_v46, %v2267_v5 }
 0x23f   : > { %v505_v50 = vsel %vm324_vm0, %v2339_v44, -inf  ;;  %v512_v7 = vsel %vm324_vm0, %v2342_v45, -inf  ;;  %v540_v9 = vsel %vm324_vm0, %v2339_v44, 0.0  ;;  %v547_v51 = vsel %vm324_vm0, %v2342_v45, 0.0 }
 0x240   : > { %v506_v52 = vrot.slane %v505_v50, 4  ;;  %v513_v53 = vrot.slane %v512_v7, 4  ;;  %v541_v54 = vrot.slane %v540_v9, 4  ;;  %v548_v1 = vrot.slane %v547_v51, 4 }
 0x241   : > { %v376_v5 = vsel %vm324_vm0, %v2348_v48, -inf  ;;  %v383_v55 = vsel %vm324_vm0, %v2351_v49, -inf  ;;  %v414_v56 = vsel %vm324_vm0, %v2348_v48, 0.0  ;;  %v421_v57 = vsel %vm324_vm0, %v2351_v49, 0.0  ;;  %v627_v38 = vpop.permute.xlu1 %626 }
 0x242   : > { %v507_v58 = vmax.f32 %v505_v50, %v506_v52  ;;  %v514_v59 = vmax.f32 %v512_v7, %v513_v53  ;;  %v542_v60 = vadd.f32 %v541_v54, %v540_v9  ;;  %v549_v61 = vadd.f32 %v548_v1, %v547_v51 }
 0x243   : > { %v377_v62 = vrot.slane %v376_v5, 4  ;;  %v384_v63 = vrot.slane %v383_v55, 4  ;;  %v415_v4 = vrot.slane %v414_v56, 4  ;;  %v422_v6 = vrot.slane %v421_v57, 4 }
 0x244   : > { %v508_v11 = vrot.slane %v507_v58, 2  ;;  %v515_v12 = vrot.slane %v514_v59, 2  ;;  %v543_v13 = vrot.slane %v542_v60, 2  ;;  %v550_v14 = vrot.slane %v549_v61, 2 }
 0x245   : > { %v378_v15 = vmax.f32 %v376_v5, %v377_v62  ;;  %v385_v16 = vmax.f32 %v383_v55, %v384_v63  ;;  %v416_v17 = vadd.f32 %v415_v4, %v414_v56  ;;  %v423_v18 = vadd.f32 %v422_v6, %v421_v57  ;;  %v753_v4 = vpop.permute.xlu1 %752 }
 0x246   : > { %v509_v20 = vmax.f32 %v507_v58, %v508_v11  ;;  %v516_v21 = vmax.f32 %v514_v59, %v515_v12  ;;  %v544_v22 = vadd.f32 %v543_v13, %v542_v60  ;;  %v551_v23 = vadd.f32 %v550_v14, %v549_v61 }
 0x247   : > { %v379_v25 = vrot.slane %v378_v15, 2  ;;  %v386_v26 = vrot.slane %v385_v16, 2  ;;  %v417_v27 = vrot.slane %v416_v17, 2  ;;  %v424_v28 = vrot.slane %v423_v18, 2 }
 0x248   : > { %v510_v30 = vrot.slane %v509_v20, 1  ;;  %v517_v31 = vrot.slane %v516_v21, 1  ;;  %v545_v32 = vrot.slane %v544_v22, 1  ;;  %v552_v33 = vrot.slane %v551_v23, 1 }
 0x249   : > { %v380_v34 = vmax.f32 %v378_v15, %v379_v25  ;;  %v387_v35 = vmax.f32 %v385_v16, %v386_v26  ;;  %v418_v36 = vadd.f32 %v417_v27, %v416_v17  ;;  %v425_v37 = vadd.f32 %v424_v28, %v423_v18 }
 0x24a   : > { %v511_v39 = vmax.f32 %v509_v20, %v510_v30  ;;  %v518_v40 = vmax.f32 %v516_v21, %v517_v31  ;;  %v546_v41 = vadd.f32 %v545_v32, %v544_v22  ;;  %v553_v42 = vadd.f32 %v552_v33, %v551_v23 }
 0x24b   : > { %v381_v43 = vrot.slane %v380_v34, 1  ;;  %v388_v46 = vrot.slane %v387_v35, 1  ;;  %v419_v50 = vrot.slane %v418_v36, 1  ;;  %v426_v7 = vrot.slane %v425_v37, 1 }
 0x24c   : > { %v521_v9 = vcombine.low %v511_v39, %v518_v40  ;;  %v554_v51 = vmul.f32 0.25, %v546_v41  ;;  %v555_v52 = vmul.f32 0.25, %v553_v42  ;;  %v2375_v53 = vmul.f32 %v2253_v0, %v627_v38 }
 0x24d   : > { %v382_v54 = vmax.f32 %v380_v34, %v381_v43  ;;  %v389_v1 = vmax.f32 %v387_v35, %v388_v46  ;;  %v420_v5 = vadd.f32 %v419_v50, %v418_v36  ;;  %v427_v55 = vadd.f32 %v426_v7, %v425_v37 }
 0x24e   : > { %v528_v56 = vrot.slane %v521_v9, %v2345_v47  ;;  %v558_v57 = vcombine.low %v554_v51, %v555_v52  ;;  %v2379_v58 = vmul.f32 %v627_v38, %v2261_v3  ;;  %v631_v59 = vsel %vm324_vm0, %v2375_v53, -inf }
 0x24f   : > { %v392_v60 = vcombine.low %v382_v54, %v389_v1  ;;  %v428_v61 = vmul.f32 0.25, %v420_v5  ;;  %v429_v62 = vmul.f32 0.25, %v427_v55  ;;  %v632_v63 = vrot.slane %v631_v59, 4 }
 0x250   : > { %v535_v0 = vrot.slane %v528_v56, %v2345_v47  ;;  %v565_v6 = vrot.slane %v558_v57, %v2345_v47  ;;  %v638_v11 = vsel %vm324_vm0, %v2379_v58, -inf  ;;  %v666_v12 = vsel %vm324_vm0, %v2375_v53, 0.0 }
 0x251   : > { %v399_v3 = vrot.slane %v392_v60, %v2345_v47  ;;  %v432_v13 = vcombine.low %v428_v61, %v429_v62  ;;  %v633_v14 = vmax.f32 %v631_v59, %v632_v63  ;;  %v639_v15 = vrot.slane %v638_v11, 4 }
 0x252   : > { %538 = vst.msk [vmem:[#allocation2 + $0x1] ss:$8 sm:$0x3] %vm2370_vm3, %v535_v0  ;;  %v572_v16 = vrot.slane %v565_v6, %v2345_v47  ;;  %v667_v17 = vrot.slane %v666_v12, 4  ;;  %v673_v18 = vsel %vm324_vm0, %v2379_v58, 0.0  ;;  %v2396_v20 = vmul.f32 %v2257_v2, %v753_v4 }
 0x253   : > { %v406_v21 = vrot.slane %v399_v3, %v2345_v47  ;;  %v439_v22 = vrot.slane %v432_v13, %v2345_v47  ;;  %v634_v23 = vrot.slane %v633_v14, 2  ;;  %v640_v25 = vmax.f32 %v638_v11, %v639_v15 }
 0x254   : > { %575 = vst.msk [vmem:[#allocation2 + $0x5] ss:$8 sm:$0x3] %vm2370_vm3, %v572_v16  ;;  %v668_v26 = vadd.f32 %v667_v17, %v666_v12  ;;  %v674_v27 = vrot.slane %v673_v18, 4  ;;  %v2403_v28 = vmul.f32 %v753_v4, %v2275_v8  ;;  %v757_v30 = vsel %vm324_vm0, %v2396_v20, -inf }
 0x255   : > { %412 = vst.msk [vmem:[#allocation2] ss:$8 sm:$0x3] %vm2370_vm3, %v406_v21  ;;  %v446_v2 = vrot.slane %v439_v22, %v2345_v47  ;;  %v635_v31 = vmax.f32 %v633_v14, %v634_v23  ;;  %v641_v32 = vrot.slane %v640_v25, 2  ;;  %v758_v33 = vrot.slane %v757_v30, 4 }
 0x256   : > { %v669_v34 = vrot.slane %v668_v26, 2  ;;  %v675_v35 = vadd.f32 %v674_v27, %v673_v18  ;;  %v764_v36 = vsel %vm324_vm0, %v2403_v28, -inf  ;;  %v792_v8 = vsel %vm324_vm0, %v2396_v20, 0.0 }
 0x257   : > { %449 = vst.msk [vmem:[#allocation2 + $0x4] ss:$8 sm:$0x3] %vm2370_vm3, %v446_v2  ;;  %v636_v37 = vrot.slane %v635_v31, 1  ;;  %v642_v38 = vmax.f32 %v640_v25, %v641_v32  ;;  %v759_v39 = vmax.f32 %v757_v30, %v758_v33  ;;  %v765_v40 = vrot.slane %v764_v36, 4 }
 0x258   : > { %v670_v41 = vadd.f32 %v669_v34, %v668_v26  ;;  %v676_v42 = vrot.slane %v675_v35, 2  ;;  %v793_v43 = vrot.slane %v792_v8, 4  ;;  %v799_v46 = vsel %vm324_vm0, %v2403_v28, 0.0 }
 0x259   : > { %v637_v50 = vmax.f32 %v635_v31, %v636_v37  ;;  %v643_v7 = vrot.slane %v642_v38, 1  ;;  %v760_v9 = vrot.slane %v759_v39, 2  ;;  %v766_v51 = vmax.f32 %v764_v36, %v765_v40 }
 0x25a   : > { %v671_v52 = vrot.slane %v670_v41, 1  ;;  %v677_v54 = vadd.f32 %v676_v42, %v675_v35  ;;  %v794_v1 = vadd.f32 %v793_v43, %v792_v8  ;;  %v800_v5 = vrot.slane %v799_v46, 4 }
 0x25b   : > { %v644_v55 = vmax.f32 %v642_v38, %v643_v7  ;;  %v761_v56 = vmax.f32 %v759_v39, %v760_v9  ;;  %v767_v57 = vrot.slane %v766_v51, 2  ;;  %v2502_v42 = vand.u32 127, %v349_v10 }
 0x25c   : > { %v672_v59 = vadd.f32 %v671_v52, %v670_v41  ;;  %v678_v60 = vrot.slane %v677_v54, 1  ;;  %v795_v61 = vrot.slane %v794_v1, 2  ;;  %v801_v62 = vadd.f32 %v800_v5, %v799_v46 }
 0x25d   : > { %v647_v63 = vcombine.low %v637_v50, %v644_v55  ;;  %v762_v4 = vrot.slane %v761_v56, 1  ;;  %v768_v0 = vmax.f32 %v766_v51, %v767_v57  ;;  %vm850_vm4 = vcmp.lt.s32.totalorder %v2502_v42, 50 }
 0x25e   : > { %v679_v6 = vadd.f32 %v678_v60, %v677_v54  ;;  %v680_v11 = vmul.f32 0.25, %v672_v59  ;;  %v796_v12 = vadd.f32 %v795_v61, %v794_v1  ;;  %v802_v3 = vrot.slane %v801_v62, 2  ;;  %v840_v59 = vld [vmem:[#allocation3] sm:$0xff]  ;;  %v841_v61 = vld [vmem:[#allocation3 + $0x8] sm:$0xff] }
 0x25f   : > { %v654_v13 = vrot.slane %v647_v63, %v2345_v47  ;;  %v763_v14 = vmax.f32 %v761_v56, %v762_v4  ;;  %v769_v15 = vrot.slane %v768_v0, 1  ;;  %vm864_vm5 = vcmp.lt.s32.totalorder %v2502_v42, 49  ;;  %v896_v63 = vld [vmem:[#allocation3 + $0x40] sm:$0xff]  ;;  %v897_v4 = vld [vmem:[#allocation3 + $0x48] sm:$0xff] }
 0x260   : > { %v681_v16 = vmul.f32 0.25, %v679_v6  ;;  %v797_v17 = vrot.slane %v796_v12, 1  ;;  %v803_v18 = vadd.f32 %v802_v3, %v801_v62  ;;  %vm878_vm6 = vcmp.lt.s32.totalorder %v2502_v42, 48 }
 0x261   : > { %v661_v21 = vrot.slane %v654_v13, %v2345_v47  ;;  %v770_v22 = vmax.f32 %v768_v0, %v769_v15  ;;  %vm837_vm7 = vcmp.lt.s32.totalorder %v2502_v42, 51  ;;  %vm892_vm8 = vcmp.lt.s32.totalorder %v2502_v42, 47 }
 0x262   : > { %v684_v23 = vcombine.low %v680_v11, %v681_v16  ;;  %v798_v25 = vadd.f32 %v797_v17, %v796_v12  ;;  %v804_v26 = vrot.slane %v803_v18, 1  ;;  %vm906_vm9 = vcmp.lt.s32.totalorder %v2502_v42, 46  ;;  %v855_v17 = vld [vmem:[#allocation3 + $0x18] sm:$0xff] }
 0x263   : > { %664 = vst.msk [vmem:[#allocation2 + $0x2] ss:$8 sm:$0x3] %vm2370_vm3, %v661_v21  ;;  %v773_v27 = vcombine.low %v763_v14, %v770_v22  ;;  %v854_v14 = vld [vmem:[#allocation3 + $0x10] sm:$0xff]  ;;  %v911_v21 = vld [vmem:[#allocation3 + $0x58] sm:$0xff]  ;;  %vm920_vm10 = vcmp.lt.s32.totalorder %v2502_v42, 45 }
 0x264   : > { %v691_v30 = vrot.slane %v684_v23, %v2345_v47  ;;  %v805_v2 = vadd.f32 %v804_v26, %v803_v18  ;;  %v806_v31 = vmul.f32 0.25, %v798_v25  ;;  %v910_v18 = vld [vmem:[#allocation3 + $0x50] sm:$0xff]  ;;  %vm934_vm11 = vcmp.lt.s32.totalorder %v2502_v42, 35 }
 0x265   : > { %v780_v32 = vrot.slane %v773_v27, %v2345_v47  ;;  %vm948_vm12 = vcmp.lt.s32.totalorder %v2502_v42, 34  ;;  %vm962_vm13 = vcmp.lt.s32.totalorder %v2502_v42, 33  ;;  %vm976_vm14 = vcmp.lt.s32.totalorder %v2502_v42, 32 }
 0x266   : > { %v698_v33 = vrot.slane %v691_v30, %v2345_v47  ;;  %v807_v34 = vmul.f32 0.25, %v805_v2  ;;  %vm990_vm15 = vcmp.lt.s32.totalorder %v2502_v42, 31  ;;  %vm1004_vm0 = vcmp.lt.s32.totalorder %v2502_v42, 30 }
 0x267   : > { %v787_v35 = vrot.slane %v780_v32, %v2345_v47  ;;  %v868_v32 = vld [vmem:[#allocation3 + $0x20] sm:$0xff]  ;;  %vm1018_vm1 = vcmp.lt.s32.totalorder %v2502_v42, 29  ;;  %vm1032_vm2 = vcmp.lt.s32.totalorder %v2502_v42, 19 }
 0x268   : > { %701 = vst.msk [vmem:[#allocation2 + $0x6] ss:$8 sm:$0x3] %vm2370_vm3, %v698_v33  ;;  %v810_v36 = vcombine.low %v806_v31, %v807_v34 }
 0x269   : > { %790 = vst.msk [vmem:[#allocation2 + $0x3] ss:$8 sm:$0x3] %vm2370_vm3, %v787_v35  ;;  %v869_v35 = vld [vmem:[#allocation3 + $0x28] sm:$0xff] }
 0x26a   : > { %v817_v8 = vrot.slane %v810_v36, %v2345_v47  ;;  %v924_v36 = vld [vmem:[#allocation3 + $0x60] sm:$0xff] }
 0x26c   : > { %v824_v37 = vrot.slane %v817_v8, %v2345_v47  ;;  %v925_v8 = vld [vmem:[#allocation3 + $0x68] sm:$0xff] }
 0x26e   : > { %827 = vst.msk [vmem:[#allocation2 + $0x7] ss:$8 sm:$0x3] %vm2370_vm3, %v824_v37  ;;  %vm1046_vm3 = vcmp.lt.s32.totalorder %v2502_v42, 18 }
 0x275   : > { %v2434_v38 = vld [vmem:[#allocation2] sm:$0xff]  ;;  %v2436_v39 = vld [vmem:[#allocation2 + $0x8] sm:$0xff] }
 0x276   : > { %862 = vrot.lane.b32.xlu0 %v2436_v39, %s2009_s20  ;;  %831 = vrot.lane.b32.xlu1 %v2434_v38, %s2010_s16 }
 0x27a   : > { %876 = vrot.lane.b32.xlu0 %v2436_v39, %s2011_s30  ;;  %833 = vrot.lane.b32.xlu1 %v2436_v39, %s2010_s16  ;;  %s2022_s16 = smov 29  }
 0x27e   : > { %890 = vrot.lane.b32.xlu0 %v2436_v39, %s2012_s9  ;;  %846 = vrot.lane.b32.xlu1 %v2434_v38, %s2013_s14 }
 0x282   : > { %904 = vrot.lane.b32.xlu0 %v2436_v39, %s2014_s15  ;;  %848 = vrot.lane.b32.xlu1 %v2436_v39, %s2013_s14  ;;  %s2025_s14 = smov 17  }
 0x286   : > { %918 = vrot.lane.b32.xlu0 %v2436_v39, %s2015_s29  ;;  %860 = vrot.lane.b32.xlu1 %v2434_v38, %s2009_s20  ;;  %s2021_s20 = smov 30  }
 0x28a   : > { %932 = vrot.lane.b32.xlu0 %v2436_v39, %s2016_s11  ;;  %874 = vrot.lane.b32.xlu1 %v2434_v38, %s2011_s30  ;;  %s2023_s30 = smov 19  }
 0x28e   : > { %946 = vrot.lane.b32.xlu0 %v2436_v39, %s2017_s17  ;;  %888 = vrot.lane.b32.xlu1 %v2434_v38, %s2012_s9  ;;  %s2024_s9 = smov 18  }
 0x292   : > { %960 = vrot.lane.b32.xlu0 %v2436_v39, %s2018_s21  ;;  %902 = vrot.lane.b32.xlu1 %v2434_v38, %s2014_s15  ;;  %s2026_s15 = smov 16  }
 0x296   : > { %974 = vrot.lane.b32.xlu0 %v2436_v39, %s2019_s10  ;;  %916 = vrot.lane.b32.xlu1 %v2434_v38, %s2015_s29  ;;  %s2027_s29 = smov 15  }
 0x29a   : > { %988 = vrot.lane.b32.xlu0 %v2436_v39, %s2020_s22  ;;  %930 = vrot.lane.b32.xlu1 %v2434_v38, %s2016_s11  ;;  %s2028_s11 = smov 14  }
 0x29e   : > { %1002 = vrot.lane.b32.xlu0 %v2436_v39, %s2021_s20  ;;  %944 = vrot.lane.b32.xlu1 %v2434_v38, %s2017_s17  ;;  %s2029_s17 = smov 13  }
 0x2a2   : > { %1016 = vrot.lane.b32.xlu0 %v2436_v39, %s2022_s16  ;;  %958 = vrot.lane.b32.xlu1 %v2434_v38, %s2018_s21  ;;  %s2030_s21 = smov 3  }
 0x2a6   : > { %1030 = vrot.lane.b32.xlu0 %v2436_v39, %s2023_s30  ;;  %972 = vrot.lane.b32.xlu1 %v2434_v38, %s2019_s10  ;;  %s2031_s10 = smov 2  }
 0x2aa   : > { %1044 = vrot.lane.b32.xlu0 %v2436_v39, %s2024_s9  ;;  %986 = vrot.lane.b32.xlu1 %v2434_v38, %s2020_s22  ;;  %s2032_s22 = smov 1  }
 0x2ae   : > { %1058 = vrot.lane.b32.xlu0 %v2436_v39, %s2025_s14  ;;  %1000 = vrot.lane.b32.xlu1 %v2434_v38, %s2021_s20  ;;  %s2033_s20 = smov 127  }
 0x2b2   : > { %1072 = vrot.lane.b32.xlu0 %v2436_v39, %s2026_s15  ;;  %1014 = vrot.lane.b32.xlu1 %v2434_v38, %s2022_s16  ;;  %s2034_s16 = smov 126  }
 0x2b6   : > { %1086 = vrot.lane.b32.xlu0 %v2436_v39, %s2027_s29  ;;  %1028 = vrot.lane.b32.xlu1 %v2434_v38, %s2023_s30  ;;  %s2035_s30 = smov 125  }
 0x2ba   : > { %1100 = vrot.lane.b32.xlu0 %v2436_v39, %s2028_s11  ;;  %1042 = vrot.lane.b32.xlu1 %v2434_v38, %s2024_s9  ;;  %s2036_s9 = smov 115  }
 0x2be   : > { %1114 = vrot.lane.b32.xlu0 %v2436_v39, %s2029_s17  ;;  %1056 = vrot.lane.b32.xlu1 %v2434_v38, %s2025_s14  ;;  %s2037_s14 = smov 114  }
 0x2c2   : > { %1128 = vrot.lane.b32.xlu0 %v2436_v39, %s2030_s21  ;;  %1070 = vrot.lane.b32.xlu1 %v2434_v38, %s2026_s15  ;;  %s2038_s15 = smov 113  }
 0x2c6   : > { %1142 = vrot.lane.b32.xlu0 %v2436_v39, %s2031_s10  ;;  %1084 = vrot.lane.b32.xlu1 %v2434_v38, %s2027_s29  ;;  %s2039_s29 = smov 112  }
 0x2ca   : > { %1156 = vrot.lane.b32.xlu0 %v2436_v39, %s2032_s22  ;;  %1098 = vrot.lane.b32.xlu1 %v2434_v38, %s2028_s11  ;;  %s2040_s11 = smov 111  }
 0x2ce   : > { %1177 = vrot.lane.b32.xlu0 %v2436_v39, %s2033_s20  ;;  %1112 = vrot.lane.b32.xlu1 %v2434_v38, %s2029_s17  ;;  %s2041_s17 = smov 110  }
 0x2d2   : > { %1191 = vrot.lane.b32.xlu0 %v2436_v39, %s2034_s16  ;;  %1126 = vrot.lane.b32.xlu1 %v2434_v38, %s2030_s21  ;;  %s2042_s21 = smov 109  }
 0x2d6   : > { %1205 = vrot.lane.b32.xlu0 %v2436_v39, %s2035_s30  ;;  %1140 = vrot.lane.b32.xlu1 %v2434_v38, %s2031_s10  ;;  %s2043_s10 = smov 99  }
 0x2da   : > { %1219 = vrot.lane.b32.xlu0 %v2436_v39, %s2036_s9  ;;  %1154 = vrot.lane.b32.xlu1 %v2434_v38, %s2032_s22  ;;  %s2044_s22 = smov 98  }
 0x2de   : > { %1233 = vrot.lane.b32.xlu0 %v2436_v39, %s2037_s14  ;;  %1175 = vrot.lane.b32.xlu1 %v2434_v38, %s2033_s20  ;;  %s2045_s20 = smov 97  }
 0x2e2   : > { %1247 = vrot.lane.b32.xlu0 %v2436_v39, %s2038_s15  ;;  %1189 = vrot.lane.b32.xlu1 %v2434_v38, %s2034_s16  ;;  %s2046_s16 = smov 96  }
 0x2e6   : > { %1261 = vrot.lane.b32.xlu0 %v2436_v39, %s2039_s29  ;;  %1203 = vrot.lane.b32.xlu1 %v2434_v38, %s2035_s30  ;;  %s2047_s30 = smov 95  }
 0x2e8   : > { %v863_v47 = vpop.permute.xlu0 %862  ;;  %v832_v24 = vpop.permute.xlu1 %831 }
 0x2ea   : > { %1275 = vrot.lane.b32.xlu0 %v2436_v39, %s2040_s11  ;;  %1217 = vrot.lane.b32.xlu1 %v2434_v38, %s2036_s9  ;;  %s2048_s9 = smov 94  }
 0x2ec   : > { %v877_v40 = vpop.permute.xlu0 %876  ;;  %v834_v41 = vpop.permute.xlu1 %833 }
 0x2ed   : > { %v839_v60 = vsel %vm837_vm7, %v834_v41, %v832_v24  ;;  %v838_v62 = vsel %vm837_vm7, %v832_v24, %v834_v41  ;;  %vm1102_vm7 = vcmp.lt.s32.totalorder %v2502_v42, 14 }
 0x2ee   : > { %1289 = vrot.lane.b32.xlu0 %v2436_v39, %s2041_s17  ;;  %1231 = vrot.lane.b32.xlu1 %v2434_v38, %s2037_s14  ;;  %v842_v11 = vmul.f32 %v840_v59, %v839_v60  ;;  %v843_v13 = vmul.f32 %v841_v61, %v838_v62  ;;  %s2049_s14 = smov 93  }
 0x2f0   : > { %v891_v43 = vpop.permute.xlu0 %890  ;;  %v847_v46 = vpop.permute.xlu1 %846 }
 0x2f2   : > { %1303 = vrot.lane.b32.xlu0 %v2436_v39, %s2042_s21  ;;  %1245 = vrot.lane.b32.xlu1 %v2434_v38, %s2038_s15  ;;  %s2050_s15 = smov 83  }
 0x2f4   : > { %v905_v50 = vpop.permute.xlu0 %904  ;;  %v849_v7 = vpop.permute.xlu1 %848 }
 0x2f5   : > { %v851_v9 = vsel %vm850_vm4, %v847_v46, %v849_v7  ;;  %v852_v51 = vsel %vm850_vm4, %v849_v7, %v847_v46  ;;  %v882_v7 = vld [vmem:[#allocation3 + $0x30] sm:$0xff]  ;;  %vm1060_vm4 = vcmp.lt.s32.totalorder %v2502_v42, 17 }
 0x2f6   : > { %1317 = vrot.lane.b32.xlu0 %v2436_v39, %s2043_s10  ;;  %1259 = vrot.lane.b32.xlu1 %v2434_v38, %s2039_s29  ;;  %v856_v27 = vmul.f32 %v854_v14, %v852_v51  ;;  %v857_v31 = vmul.f32 %v855_v17, %v851_v9  ;;  %s2051_s29 = smov 82  }
 0x2f8   : > { %v2512_v10 = vpop.permute.xlu0 %918  ;;  %v861_v52 = vpop.permute.xlu1 %860 }
 0x2f9   : > { %v2514_v54 = vsel %vm864_vm5, %v861_v52, %v863_v47  ;;  %v866_v1 = vsel %vm864_vm5, %v863_v47, %v861_v52  ;;  %v883_v52 = vld [vmem:[#allocation3 + $0x38] sm:$0xff]  ;;  %vm1074_vm5 = vcmp.lt.s32.totalorder %v2502_v42, 16 }
 0x2fa   : > { %1331 = vrot.lane.b32.xlu0 %v2436_v39, %s2044_s22  ;;  %1273 = vrot.lane.b32.xlu1 %v2434_v38, %s2040_s11  ;;  %v870_v41 = vmul.f32 %v868_v32, %v866_v1  ;;  %v938_v1 = vld [vmem:[#allocation3 + $0x70] sm:$0xff]  ;;  %s2052_s11 = smov 81  }
 0x2fc   : > { %v2521_v5 = vpop.permute.xlu0 %932  ;;  %v875_v55 = vpop.permute.xlu1 %874 }
 0x2fd   : > { %v2523_v56 = vsel %vm878_vm6, %v875_v55, %v877_v40  ;;  %v2525_v57 = vsel %vm878_vm6, %v877_v40, %v875_v55  ;;  %v939_v55 = vld [vmem:[#allocation3 + $0x78] sm:$0xff]  ;;  %vm1088_vm6 = vcmp.lt.s32.totalorder %v2502_v42, 15 }
 0x2fe   : > { %1345 = vrot.lane.b32.xlu0 %v2436_v39, %s2045_s20  ;;  %1287 = vrot.lane.b32.xlu1 %v2434_v38, %s2041_s17  ;;  %s2053_s17 = smov 80  }
 0x300   : > { %v2532_v0 = vpop.permute.xlu0 %946  ;;  %v889_v6 = vpop.permute.xlu1 %888 }
 0x301   : > { %v893_v12 = vsel %vm892_vm8, %v889_v6, %v891_v43  ;;  %v894_v3 = vsel %vm892_vm8, %v891_v43, %v889_v6  ;;  %vm1116_vm8 = vcmp.lt.s32.totalorder %v2502_v42, 13 }
 0x302   : > { %v898_v15 = vmul.f32 %v896_v63, %v894_v3  ;;  %v899_v16 = vmul.f32 %v897_v4, %v893_v12  ;;  %1359 = vrot.lane.b32.xlu0 %v2436_v39, %s2046_s16  ;;  %1301 = vrot.lane.b32.xlu1 %v2434_v38, %s2042_s21  ;;  %v885_v4 = vmul.f32 %v883_v52, %v2523_v56  ;;  %v952_v12 = vld [vmem:[#allocation3 + $0x80] sm:$0xff]  ;;  %v953_v3 = vld [vmem:[#allocation3 + $0x88] sm:$0xff]  ;;  %s2054_s21 = smov 79  }
 0x304   : > { %v2539_v22 = vadd.f32 %v898_v15, %v842_v11  ;;  %v2541_v23 = vadd.f32 %v899_v16, %v843_v13  ;;  %v2543_v25 = vpop.permute.xlu0 %960  ;;  %v903_v26 = vpop.permute.xlu1 %902 }
 0x305   : > { %v907_v30 = vsel %vm906_vm9, %v903_v26, %v905_v50  ;;  %v908_v2 = vsel %vm906_vm9, %v905_v50, %v903_v26  ;;  %v871_v50 = vmul.f32 %v869_v35, %v2514_v54  ;;  %v884_v54 = vmul.f32 %v882_v7, %v2525_v57 }
 0x306   : > { %v912_v33 = vmul.f32 %v910_v18, %v908_v2  ;;  %v913_v34 = vmul.f32 %v911_v21, %v907_v30  ;;  %1373 = vrot.lane.b32.xlu0 %v2436_v39, %s2047_s30  ;;  %1315 = vrot.lane.b32.xlu1 %v2434_v38, %s2043_s10  ;;  %v966_v18 = vld [vmem:[#allocation3 + $0x90] sm:$0xff]  ;;  %v967_v21 = vld [vmem:[#allocation3 + $0x98] sm:$0xff]  ;;  %s2055_s10 = smov 78   ;;  %vm1130_vm9 = vcmp.lt.s32.totalorder %v2502_v42, 3 }
 0x308   : > { %v914_v37 = vadd.f32 %v912_v33, %v856_v27  ;;  %v915_v47 = vadd.f32 %v913_v34, %v857_v31  ;;  %v2550_v24 = vpop.permute.xlu0 %974  ;;  %v917_v40 = vpop.permute.xlu1 %916  ;;  %v981_v34 = vld [vmem:[#allocation3 + $0xa8] sm:$0xff] }
 0x309   : > { %v921_v43 = vsel %vm920_vm10, %v917_v40, %v2512_v10  ;;  %v922_v46 = vsel %vm920_vm10, %v2512_v10, %v917_v40  ;;  %vm1144_vm10 = vcmp.lt.s32.totalorder %v2502_v42, 2 }
 0x30a   : > { %v926_v9 = vmul.f32 %v924_v36, %v922_v46  ;;  %v927_v51 = vmul.f32 %v925_v8, %v921_v43  ;;  %1387 = vrot.lane.b32.xlu0 %v2436_v39, %s2048_s9  ;;  %1329 = vrot.lane.b32.xlu1 %v2434_v38, %s2044_s22  ;;  %v994_v46 = vld [vmem:[#allocation3 + $0xb0] sm:$0xff]  ;;  %s2056_s22 = smov 77  }
 0x30c   : > { %v928_v59 = vadd.f32 %v926_v9, %v870_v41  ;;  %v929_v60 = vadd.f32 %v927_v51, %v871_v50  ;;  %v989_v10 = vpop.permute.xlu0 %988  ;;  %v931_v61 = vpop.permute.xlu1 %930 }
 0x30d   : > { %v935_v62 = vsel %vm934_vm11, %v931_v61, %v2521_v5  ;;  %v936_v63 = vsel %vm934_vm11, %v2521_v5, %v931_v61  ;;  %v1009_v61 = vld [vmem:[#allocation3 + $0xc8] sm:$0xff]  ;;  %vm1158_vm11 = vcmp.lt.s32.totalorder %v2502_v42, 1 }
 0x30e   : > { %v940_v6 = vmul.f32 %v938_v1, %v936_v63  ;;  %v941_v11 = vmul.f32 %v939_v55, %v935_v62  ;;  %1401 = vrot.lane.b32.xlu0 %v2436_v39, %s2049_s14  ;;  %1343 = vrot.lane.b32.xlu1 %v2434_v38, %s2045_s20  ;;  %v1008_v55 = vld [vmem:[#allocation3 + $0xc0] sm:$0xff]  ;;  %s1727_s20 = sshll.u32 %s2121_s28, 9 }
 0x310   : > { %v942_v57 = vadd.f32 %v940_v6, %v884_v54  ;;  %v943_v13 = vadd.f32 %v941_v11, %v885_v4  ;;  %v1003_v14 = vpop.permute.xlu0 %1002  ;;  %v945_v15 = vpop.permute.xlu1 %944  ;;  %v1022_v11 = vld [vmem:[#allocation3 + $0xd0] sm:$0xff] }
 0x311   : > { %v949_v5 = vsel %vm948_vm12, %v945_v15, %v2532_v0  ;;  %v950_v56 = vsel %vm948_vm12, %v2532_v0, %v945_v15  ;;  %vm1179_vm12 = vcmp.lt.s32.totalorder %v2502_v42, 127 }
 0x312   : > { %v954_v16 = vmul.f32 %v952_v12, %v950_v56  ;;  %v955_v17 = vmul.f32 %v953_v3, %v949_v5  ;;  %1415 = vrot.lane.b32.xlu0 %v2436_v39, %s2050_s15  ;;  %1357 = vrot.lane.b32.xlu1 %v2434_v38, %s2046_s16  ;;  %v1023_v12 = vld [vmem:[#allocation3 + $0xd8] sm:$0xff]  ;;  %s312_s16 = scalar_lea.vmem [#allocation8], %s1710_s23 }
 0x314   : > { %v956_v26 = vadd.f32 %v954_v16, %v2539_v22  ;;  %v957_v27 = vadd.f32 %v955_v17, %v2541_v23  ;;  %v1017_v30 = vpop.permute.xlu0 %1016  ;;  %v959_v2 = vpop.permute.xlu1 %958  ;;  %v980_v22 = vld [vmem:[#allocation3 + $0xa0] sm:$0xff] }
 0x315   : > { %v963_v0 = vsel %vm962_vm13, %v959_v2, %v2543_v25  ;;  %v964_v31 = vsel %vm962_vm13, %v2543_v25, %v959_v2  ;;  %v1036_v17 = vld [vmem:[#allocation3 + $0xe0] sm:$0xff]  ;;  %vm1193_vm13 = vcmp.lt.s32.totalorder %v2502_v42, 126 }
 0x316   : > { %v968_v32 = vmul.f32 %v966_v18, %v964_v31  ;;  %v969_v33 = vmul.f32 %v967_v21, %v963_v0  ;;  %1429 = vrot.lane.b32.xlu0 %v2436_v39, %s2051_s29  ;;  %1371 = vrot.lane.b32.xlu1 %v2434_v38, %s2047_s30  ;;  %v1037_v18 = vld [vmem:[#allocation3 + $0xe8] sm:$0xff]  ;;  %s1615_s30 = sshll.u32 %s312_s16, 4  ;;  %s2849_s30 = int_to_ptr.vmem [resolvable:$true] %s1615_s30 }
 0x318   : > { %v970_v23 = vadd.f32 %v968_v32, %v914_v37  ;;  %v971_v35 = vadd.f32 %v969_v33, %v915_v47  ;;  %v1031_v36 = vpop.permute.xlu0 %1030  ;;  %v973_v8 = vpop.permute.xlu1 %972  ;;  %v995_v37 = vld [vmem:[#allocation3 + $0xb8] sm:$0xff]  ;;  %v1050_v33 = vld [vmem:[#allocation3 + $0xf0] sm:$0xff] }
 0x319   : > { %v977_v40 = vsel %vm976_vm14, %v973_v8, %v2550_v24  ;;  %v978_v25 = vsel %vm976_vm14, %v2550_v24, %v973_v8  ;;  %vm1207_vm14 = vcmp.lt.s32.totalorder %v2502_v42, 125 }
 0x31a   : > { %v982_v41 = vmul.f32 %v980_v22, %v978_v25  ;;  %v983_v43 = vmul.f32 %v981_v34, %v977_v40  ;;  %1443 = vrot.lane.b32.xlu0 %v2436_v39, %s2052_s11  ;;  %1385 = vrot.lane.b32.xlu1 %v2434_v38, %s2048_s9  ;;  %v1051_v22 = vld [vmem:[#allocation3 + $0xf8] sm:$0xff]  ;;  %s2847_s9 = scalar_lea.hbm %s2900_s7, %s1727_s20 }
 0x31c   : > { %v984_v47 = vadd.f32 %v982_v41, %v928_v59  ;;  %v985_v50 = vadd.f32 %v983_v43, %v929_v60  ;;  %v1045_v7 = vpop.permute.xlu0 %1044  ;;  %v987_v9 = vpop.permute.xlu1 %986  ;;  %v1064_v43 = vld [vmem:[#allocation3 + $0x100] sm:$0xff] }
 0x31d   : > { %v991_v51 = vsel %vm990_vm15, %v987_v9, %v989_v10  ;;  %v992_v52 = vsel %vm990_vm15, %v989_v10, %v987_v9  ;;  %vm1221_vm15 = vcmp.lt.s32.totalorder %v2502_v42, 115 }
 0x31e   : > { %v996_v24 = vmul.f32 %v994_v46, %v992_v52  ;;  %v997_v1 = vmul.f32 %v995_v37, %v991_v51  ;;  %1457 = vrot.lane.b32.xlu0 %v2436_v39, %s2053_s17  ;;  %1399 = vrot.lane.b32.xlu1 %v2434_v38, %s2049_s14  ;;  %v1065_v46 = vld [vmem:[#allocation3 + $0x108] sm:$0xff]  ;;  %s1601_s14 = scalar_lea.sflag [#allocation5], %s2243_s12 }
 0x320   : > { %v998_v54 = vadd.f32 %v996_v24, %v942_v57  ;;  %v999_v59 = vadd.f32 %v997_v1, %v943_v13  ;;  %v1059_v60 = vpop.permute.xlu0 %1058  ;;  %v1001_v62 = vpop.permute.xlu1 %1000 }
 0x321   : > { %v1005_v63 = vsel %vm1004_vm0, %v1001_v62, %v1003_v14  ;;  %v1006_v4 = vsel %vm1004_vm0, %v1003_v14, %v1001_v62  ;;  %vm1235_vm0 = vcmp.lt.s32.totalorder %v2502_v42, 114 }
 0x322   : > { %v1010_v10 = vmul.f32 %v1008_v55, %v1006_v4  ;;  %v1011_v6 = vmul.f32 %v1009_v61, %v1005_v63  ;;  %1471 = vrot.lane.b32.xlu0 %v2436_v39, %s2054_s21  ;;  %1413 = vrot.lane.b32.xlu1 %v2434_v38, %s2050_s15  ;;  %v1079_v55 = vld [vmem:[#allocation3 + $0x118] sm:$0xff]  ;;  %s1929_s15 = scalar_lea.vmem %s2849_s30, 512 }
 0x323   : > { %p1930_p4 = scmp.ne.s32.totalorder %s2849_s30, %s1929_s15 }
 0x324   : > { %v1012_v3 = vadd.f32 %v1010_v10, %v956_v26  ;;  %v1013_v57 = vadd.f32 %v1011_v6, %v957_v27  ;;  %v1073_v13 = vpop.permute.xlu0 %1072  ;;  %v1015_v15 = vpop.permute.xlu1 %1014 }
 0x325   : > { %v1019_v5 = vsel %vm1018_vm1, %v1015_v15, %v1017_v30  ;;  %v1020_v56 = vsel %vm1018_vm1, %v1017_v30, %v1015_v15  ;;  %vm1249_vm1 = vcmp.lt.s32.totalorder %v2502_v42, 113  ;;  %p1931_p6 = pnand %p1930_p4, %p2191_p12 }
 0x326   : > { %v1024_v14 = vmul.f32 %v1022_v11, %v1020_v56  ;;  %v1025_v16 = vmul.f32 %v1023_v12, %v1019_v5  ;;  %1485 = vrot.lane.b32.xlu0 %v2436_v39, %s2055_s10  ;;  %1427 = vrot.lane.b32.xlu1 %v2434_v38, %s2051_s29  ;;  %v1093_v11 = vld [vmem:[#allocation3 + $0x128] sm:$0xff]  ;;  %s2057_s29 = smov [#allocation8]  }
 0x327   : > { %p1932_p8 = pneg %p1931_p6 }
 0x328   : > { %v1026_v21 = vadd.f32 %v1024_v14, %v970_v23  ;;  %v1027_v26 = vadd.f32 %v1025_v16, %v971_v35  ;;  %v1087_v27 = vpop.permute.xlu0 %1086  ;;  %v1029_v2 = vpop.permute.xlu1 %1028 }
 0x329   : > { %v1033_v0 = vsel %vm1032_vm2, %v1029_v2, %v1031_v36  ;;  %v1034_v31 = vsel %vm1032_vm2, %v1031_v36, %v1029_v2  ;;  %vm1263_vm2 = vcmp.lt.s32.totalorder %v2502_v42, 112 }
 0x32a   : > { %v1038_v30 = vmul.f32 %v1036_v17, %v1034_v31  ;;  %v1039_v32 = vmul.f32 %v1037_v18, %v1033_v0  ;;  %1499 = vrot.lane.b32.xlu0 %v2436_v39, %s2056_s22  ;;  %1441 = vrot.lane.b32.xlu1 %v2434_v38, %s2052_s11  ;;  %v1107_v17 = vld [vmem:[#allocation3 + $0x138] sm:$0xff]  ;;  %s1933_s11 = sshll.u32 %s2057_s29, 4  ;;  %s1934_s11 = int_to_ptr.vmem [resolvable:$false] %s1933_s11 }
 0x32b   : > { %p1936_p10 = scmp.lt.s32.totalorder %s2849_s30, %s1934_s11 }
 0x32c   : > { %v1040_v34 = vadd.f32 %v1038_v30, %v984_v47  ;;  %v1041_v23 = vadd.f32 %v1039_v32, %v985_v50  ;;  %v1101_v35 = vpop.permute.xlu0 %1100  ;;  %v1043_v8 = vpop.permute.xlu1 %1042 }
 0x32d   : > { %v1047_v40 = vsel %vm1046_vm3, %v1043_v8, %v1045_v7  ;;  %v1048_v25 = vsel %vm1046_vm3, %v1045_v7, %v1043_v8  ;;  %v1078_v7 = vld [vmem:[#allocation3 + $0x110] sm:$0xff]  ;;  %vm1277_vm3 = vcmp.lt.s32.totalorder %v2502_v42, 111 }
 0x32e   : > { %v1052_v36 = vmul.f32 %v1050_v33, %v1048_v25  ;;  %v1053_v41 = vmul.f32 %v1051_v22, %v1047_v40  ;;  %1455 = vrot.lane.b32.xlu1 %v2434_v38, %s2053_s17  ;;  %v1121_v33 = vld [vmem:[#allocation3 + $0x148] sm:$0xff]  ;;  %s1935_s17 = scalar_lea.vmem %s1934_s11, 1024 }
 0x32f   : > { %p1937_p13 = scmp.lt.s32.totalorder %s1935_s17, %s1929_s15 }
 0x330   : > { %v1054_v37 = vadd.f32 %v1052_v36, %v998_v54  ;;  %v1055_v9 = vadd.f32 %v1053_v41, %v999_v59  ;;  %v1115_v51 = vpop.permute.xlu0 %1114  ;;  %v1057_v52 = vpop.permute.xlu1 %1056 }
 0x331   : > { %v1061_v24 = vsel %vm1060_vm4, %v1057_v52, %v1059_v60  ;;  %v1062_v47 = vsel %vm1060_vm4, %v1059_v60, %v1057_v52  ;;  %v1092_v60 = vld [vmem:[#allocation3 + $0x120] sm:$0xff]  ;;  %vm1291_vm4 = vcmp.lt.s32.totalorder %v2502_v42, 110  ;;  %p1938_p3 = por %p1937_p13, %p1936_p10 }
 0x332   : > { %v1066_v50 = vmul.f32 %v1064_v43, %v1062_v47  ;;  %v1067_v1 = vmul.f32 %v1065_v46, %v1061_v24  ;;  %1469 = vrot.lane.b32.xlu1 %v2434_v38, %s2054_s21 }
 0x333   : > { %p1939_p7 = pnand %p1938_p3, %p1932_p8 }
 0x334   : > { %v1068_v61 = vadd.f32 %v1066_v50, %v1012_v3  ;;  %v1069_v62 = vadd.f32 %v1067_v1, %v1013_v57  ;;  %v1129_v63 = vpop.permute.xlu0 %1128  ;;  %v1071_v4 = vpop.permute.xlu1 %1070 }
 0x335   : > { %v1075_v10 = vsel %vm1074_vm5, %v1071_v4, %v1073_v13  ;;  %v1076_v54 = vsel %vm1074_vm5, %v1073_v13, %v1071_v4  ;;  %v1106_v13 = vld [vmem:[#allocation3 + $0x130] sm:$0xff]  ;;  %vm1305_vm5 = vcmp.lt.s32.totalorder %v2502_v42, 109 }
 0x336   : > { %v1080_v59 = vmul.f32 %v1078_v7, %v1076_v54  ;;  %v1081_v6 = vmul.f32 %v1079_v55, %v1075_v10  ;;  %1483 = vrot.lane.b32.xlu1 %v2434_v38, %s2055_s10  ;;  %v1148_v7 = vld [vmem:[#allocation3 + $0x160] sm:$0xff] }
 0x338   : > { %v1082_v12 = vadd.f32 %v1080_v59, %v1026_v21  ;;  %v1083_v15 = vadd.f32 %v1081_v6, %v1027_v26  ;;  %v1143_v5 = vpop.permute.xlu0 %1142  ;;  %v1085_v56 = vpop.permute.xlu1 %1084 }
 0x339   : > { %v1089_v14 = vsel %vm1088_vm6, %v1085_v56, %v1087_v27  ;;  %v1090_v3 = vsel %vm1088_vm6, %v1087_v27, %v1085_v56  ;;  %v1120_v27 = vld [vmem:[#allocation3 + $0x140] sm:$0xff]  ;;  %vm1319_vm6 = vcmp.lt.s32.totalorder %v2502_v42, 99 }
 0x33a   : > { %v1094_v57 = vmul.f32 %v1092_v60, %v1090_v3  ;;  %v1095_v16 = vmul.f32 %v1093_v11, %v1089_v14  ;;  %1497 = vrot.lane.b32.xlu1 %v2434_v38, %s2056_s22  ;;  %v1163_v11 = vld [vmem:[#allocation3 + $0x178] sm:$0xff] }
 0x33c   : > { %v1096_v18 = vadd.f32 %v1094_v57, %v1040_v34  ;;  %v1097_v2 = vadd.f32 %v1095_v16, %v1041_v23  ;;  %v1157_v0 = vpop.permute.xlu0 %1156  ;;  %v1099_v31 = vpop.permute.xlu1 %1098  ;;  %v1134_v34 = vld [vmem:[#allocation3 + $0x150] sm:$0xff]  ;;  %v1135_v23 = vld [vmem:[#allocation3 + $0x158] sm:$0xff] }
 0x33d   : > { %v1103_v30 = vsel %vm1102_vm7, %v1099_v31, %v1101_v35  ;;  %v1104_v21 = vsel %vm1102_vm7, %v1101_v35, %v1099_v31  ;;  %vm1333_vm7 = vcmp.lt.s32.totalorder %v2502_v42, 98 }
 0x33e   : > { %v1108_v26 = vmul.f32 %v1106_v13, %v1104_v21  ;;  %v1109_v32 = vmul.f32 %v1107_v17, %v1103_v30 }
 0x340   : > { %v1110_v22 = vadd.f32 %v1108_v26, %v1054_v37  ;;  %v1111_v8 = vadd.f32 %v1109_v32, %v1055_v9  ;;  %v1178_v40 = vpop.permute.xlu0 %1177  ;;  %v1113_v25 = vpop.permute.xlu1 %1112 }
 0x341   : > { %v1117_v36 = vsel %vm1116_vm8, %v1113_v25, %v1115_v51  ;;  %v1118_v41 = vsel %vm1116_vm8, %v1115_v51, %v1113_v25  ;;  %v1149_v51 = vld [vmem:[#allocation3 + $0x168] sm:$0xff]  ;;  %vm1347_vm8 = vcmp.lt.s32.totalorder %v2502_v42, 97 }
 0x342   : > { %v1122_v43 = vmul.f32 %v1120_v27, %v1118_v41  ;;  %v1123_v46 = vmul.f32 %v1121_v33, %v1117_v36 }
 0x344   : > { %v2626_v52 = vadd.f32 %v1122_v43, %v1068_v61  ;;  %v2628_v35 = vadd.f32 %v1123_v46, %v1069_v62  ;;  %v1192_v24 = vpop.permute.xlu0 %1191  ;;  %v1127_v47 = vpop.permute.xlu1 %1126  ;;  %v1162_v62 = vld [vmem:[#allocation3 + $0x170] sm:$0xff] }
 0x345   : > { %v1131_v50 = vsel %vm1130_vm9, %v1127_v47, %v1129_v63  ;;  %v1132_v1 = vsel %vm1130_vm9, %v1129_v63, %v1127_v47  ;;  %vm1361_vm9 = vcmp.lt.s32.totalorder %v2502_v42, 96 }
 0x346   : > { %v1136_v37 = vmul.f32 %v1134_v34, %v1132_v1  ;;  %v1137_v9 = vmul.f32 %v1135_v23, %v1131_v50 }
 0x348   : > { %v1138_v55 = vadd.f32 %v1136_v37, %v1082_v12  ;;  %v1139_v4 = vadd.f32 %v1137_v9, %v1083_v15  ;;  %v1206_v10 = vpop.permute.xlu0 %1205  ;;  %v1141_v54 = vpop.permute.xlu1 %1140  ;;  %v1183_v12 = vld [vmem:[#allocation3 + $0x190] sm:$0xff]  ;;  %v1184_v15 = vld [vmem:[#allocation3 + $0x198] sm:$0xff] }
 0x349   : > { %v1145_v59 = vsel %vm1144_vm10, %v1141_v54, %v1143_v5  ;;  %v1146_v6 = vsel %vm1144_vm10, %v1143_v5, %v1141_v54  ;;  %v1226_v54 = vld [vmem:[#allocation3 + $0x1c8] sm:$0xff]  ;;  %vm1375_vm10 = vcmp.lt.s32.totalorder %v2502_v42, 95 }
 0x34a   : > { %v1150_v61 = vmul.f32 %v1148_v7, %v1146_v6  ;;  %v1151_v60 = vmul.f32 %v1149_v51, %v1145_v59  ;;  %v1169_v7 = vld [vmem:[#allocation3 + $0x180] sm:$0xff]  ;;  %v1170_v51 = vld [vmem:[#allocation3 + $0x188] sm:$0xff] }
 0x34c   : > { %v1152_v56 = vadd.f32 %v1150_v61, %v1096_v18  ;;  %v1153_v63 = vadd.f32 %v1151_v60, %v1097_v2  ;;  %v1220_v14 = vpop.permute.xlu0 %1219  ;;  %v1155_v3 = vpop.permute.xlu1 %1154  ;;  %v1197_v18 = vld [vmem:[#allocation3 + $0x1a0] sm:$0xff]  ;;  %v1198_v2 = vld [vmem:[#allocation3 + $0x1a8] sm:$0xff]  ;;  %v1172_v60 = vmul.f32 %v1170_v51, %v2436_v39 }
 0x34d   : > { %v1159_v57 = vsel %vm1158_vm11, %v1155_v3, %v1157_v0  ;;  %v1160_v16 = vsel %vm1158_vm11, %v1157_v0, %v1155_v3  ;;  %vm1389_vm11 = vcmp.lt.s32.totalorder %v2502_v42, 94 }
 0x34e   : > { %v1164_v13 = vmul.f32 %v1162_v62, %v1160_v16  ;;  %v1165_v17 = vmul.f32 %v1163_v11, %v1159_v57  ;;  %v1171_v11 = vmul.f32 %v1169_v7, %v2434_v38 }
 0x350   : > { %v1166_v31 = vadd.f32 %v1164_v13, %v1110_v22  ;;  %v1167_v5 = vadd.f32 %v1165_v17, %v1111_v8  ;;  %v1234_v30 = vpop.permute.xlu0 %1233  ;;  %v1176_v21 = vpop.permute.xlu1 %1175  ;;  %v1211_v22 = vld [vmem:[#allocation3 + $0x1b0] sm:$0xff]  ;;  %v1212_v8 = vld [vmem:[#allocation3 + $0x1b8] sm:$0xff]  ;;  %v1173_v3 = vadd.f32 %v1171_v11, %v2626_v52 }
 0x351   : > { %v1180_v26 = vsel %vm1179_vm12, %v1176_v21, %v1178_v40  ;;  %v1181_v32 = vsel %vm1179_vm12, %v1178_v40, %v1176_v21  ;;  %v1239_v13 = vld [vmem:[#allocation3 + $0x1d0] sm:$0xff]  ;;  %v1240_v17 = vld [vmem:[#allocation3 + $0x1d8] sm:$0xff]  ;;  %vm1417_vm12 = vcmp.lt.s32.totalorder %v2502_v42, 83 }
 0x352   : > { %v1185_v27 = vmul.f32 %v1183_v12, %v1180_v26  ;;  %v1186_v33 = vmul.f32 %v1184_v15, %v1181_v32  ;;  %v1254_v26 = vld [vmem:[#allocation3 + $0x1e8] sm:$0xff]  ;;  %v1268_v11 = vld [vmem:[#allocation3 + $0x1f8] sm:$0xff] }
 0x354   : > { %v1187_v25 = vadd.f32 %v1185_v27, %v1138_v55  ;;  %v1188_v0 = vadd.f32 %v1186_v33, %v1139_v4  ;;  %v1248_v36 = vpop.permute.xlu0 %1247  ;;  %v1190_v41 = vpop.permute.xlu1 %1189 }
 0x355   : > { %v1194_v43 = vsel %vm1193_vm13, %v1190_v41, %v1192_v24  ;;  %v1195_v46 = vsel %vm1193_vm13, %v1192_v24, %v1190_v41  ;;  %v1225_v24 = vld [vmem:[#allocation3 + $0x1c0] sm:$0xff]  ;;  %vm1431_vm13 = vcmp.lt.s32.totalorder %v2502_v42, 82 }
 0x356   : > { %v1199_v34 = vmul.f32 %v1197_v18, %v1194_v43  ;;  %v1200_v23 = vmul.f32 %v1198_v2, %v1195_v46 }
 0x358   : > { %v1201_v47 = vadd.f32 %v1199_v34, %v1152_v56  ;;  %v1202_v40 = vadd.f32 %v1200_v23, %v1153_v63  ;;  %v2635_v50 = vpop.permute.xlu0 %1261  ;;  %v1204_v1 = vpop.permute.xlu1 %1203  ;;  %v1174_v63 = vadd.f32 %v1172_v60, %v2628_v35  ;;  %v1253_v35 = vld [vmem:[#allocation3 + $0x1e0] sm:$0xff] }
 0x359   : > { %v1208_v37 = vsel %vm1207_vm14, %v1204_v1, %v1206_v10  ;;  %v1209_v9 = vsel %vm1207_vm14, %v1206_v10, %v1204_v1  ;;  %vm1403_vm14 = vcmp.lt.s32.totalorder %v2502_v42, 93 }
 0x35a   : > { %v1213_v55 = vmul.f32 %v1211_v22, %v1208_v37  ;;  %v1214_v4 = vmul.f32 %v1212_v8, %v1209_v9 }
 0x35c   : > { %v2638_v59 = vadd.f32 %v1213_v55, %v1166_v31  ;;  %v2640_v6 = vadd.f32 %v1214_v4, %v1167_v5  ;;  %v2642_v61 = vpop.permute.xlu0 %1275  ;;  %v1218_v62 = vpop.permute.xlu1 %1217 }
 0x35d   : > { %v1222_v10 = vsel %vm1221_vm15, %v1218_v62, %v1220_v14  ;;  %v1223_v56 = vsel %vm1221_vm15, %v1220_v14, %v1218_v62  ;;  %v1267_v62 = vld [vmem:[#allocation3 + $0x1f0] sm:$0xff]  ;;  %vm1473_vm15 = vcmp.lt.s32.totalorder %v2502_v42, 79 }
 0x35e   : > { %v1227_v57 = vmul.f32 %v1225_v24, %v1222_v10  ;;  %v1228_v16 = vmul.f32 %v1226_v54, %v1223_v56 }
 0x360   : > { %v2649_v12 = vadd.f32 %v1227_v57, %v1173_v3  ;;  %v2651_v15 = vadd.f32 %v1228_v16, %v1174_v63  ;;  %v2653_v39 = vpop.permute.xlu0 %1289  ;;  %v1232_v31 = vpop.permute.xlu1 %1231  ;;  %v1281_v3 = vld [vmem:[#allocation3 + $0x200] sm:$0xff]  ;;  %v1282_v57 = vld [vmem:[#allocation3 + $0x208] sm:$0xff] }
 0x361   : > { %v1236_v38 = vsel %vm1235_vm0, %v1232_v31, %v1234_v30  ;;  %v1237_v5 = vsel %vm1235_vm0, %v1234_v30, %v1232_v31  ;;  %vm1445_vm0 = vcmp.lt.s32.totalorder %v2502_v42, 81 }
 0x362   : > { %v1241_v14 = vmul.f32 %v1239_v13, %v1236_v38  ;;  %v1242_v21 = vmul.f32 %v1240_v17, %v1237_v5 }
 0x364   : > { %v2656_v52 = vadd.f32 %v1241_v14, %v1187_v25  ;;  %v2658_v32 = vadd.f32 %v1242_v21, %v1188_v0  ;;  %v2660_v27 = vpop.permute.xlu0 %1303  ;;  %v1246_v33 = vpop.permute.xlu1 %1245  ;;  %v1295_v21 = vld [vmem:[#allocation3 + $0x210] sm:$0xff] }
 0x365   : > { %v1250_v18 = vsel %vm1249_vm1, %v1246_v33, %v1248_v36  ;;  %v1251_v2 = vsel %vm1249_vm1, %v1248_v36, %v1246_v33  ;;  %vm1459_vm1 = vcmp.lt.s32.totalorder %v2502_v42, 80 }
 0x366   : > { %v1255_v41 = vmul.f32 %v1253_v35, %v1250_v18  ;;  %v1256_v43 = vmul.f32 %v1254_v26, %v1251_v2  ;;  %v1309_v2 = vld [vmem:[#allocation3 + $0x220] sm:$0xff] }
 0x368   : > { %v2662_v46 = vadd.f32 %v1255_v41, %v1201_v47  ;;  %v2664_v30 = vadd.f32 %v1256_v43, %v1202_v40  ;;  %v1318_v34 = vpop.permute.xlu0 %1317  ;;  %v1260_v23 = vpop.permute.xlu1 %1259  ;;  %v1310_v41 = vld [vmem:[#allocation3 + $0x228] sm:$0xff] }
 0x369   : > { %v1264_v10 = vsel %vm1263_vm2, %v1260_v23, %v2635_v50  ;;  %v1265_v56 = vsel %vm1263_vm2, %v2635_v50, %v1260_v23  ;;  %vm1487_vm2 = vcmp.lt.s32.totalorder %v2502_v42, 78 }
 0x36a   : > { %v1269_v17 = vmul.f32 %v1267_v62, %v1264_v10  ;;  %v1270_v31 = vmul.f32 %v1268_v11, %v1265_v56  ;;  %v1324_v62 = vld [vmem:[#allocation3 + $0x238] sm:$0xff] }
 0x36c   : > { %v2666_v22 = vpop.permute.xlu0 %1331  ;;  %v1274_v8 = vpop.permute.xlu1 %1273  ;;  %v1271_v33 = vadd.f32 %v1269_v17, %v2638_v59  ;;  %v1272_v18 = vadd.f32 %v1270_v31, %v2640_v6  ;;  %v1365_v31 = vld [vmem:[#allocation3 + $0x260] sm:$0xff] }
 0x36d   : > { %v1278_v16 = vsel %vm1277_vm3, %v1274_v8, %v2642_v61  ;;  %v1279_v13 = vsel %vm1277_vm3, %v2642_v61, %v1274_v8  ;;  %v1296_v61 = vld [vmem:[#allocation3 + $0x218] sm:$0xff]  ;;  %vm1501_vm3 = vcmp.lt.s32.totalorder %v2502_v42, 77 }
 0x36e   : > { %v1283_v5 = vmul.f32 %v1281_v3, %v1278_v16  ;;  %v1284_v14 = vmul.f32 %v1282_v57, %v1279_v13  ;;  %v1337_v3 = vld [vmem:[#allocation3 + $0x240] sm:$0xff]  ;;  %v1351_v16 = vld [vmem:[#allocation3 + $0x250] sm:$0xff]  ;;  %v1352_v13 = vld [vmem:[#allocation3 + $0x258] sm:$0xff] }
 0x370   : > { %v2668_v25 = vpop.permute.xlu0 %1345  ;;  %v1288_v0 = vpop.permute.xlu1 %1287  ;;  %v1285_v10 = vadd.f32 %v1283_v5, %v2649_v12  ;;  %v1286_v56 = vadd.f32 %v1284_v14, %v2651_v15  ;;  %v1366_v5 = vld [vmem:[#allocation3 + $0x268] sm:$0xff] }
 0x371   : > { %v1292_v35 = vsel %vm1291_vm4, %v1288_v0, %v2653_v39  ;;  %v1293_v26 = vsel %vm1291_vm4, %v2653_v39, %v1288_v0  ;;  %v1323_v0 = vld [vmem:[#allocation3 + $0x230] sm:$0xff] }
 0x372   : > { %v1297_v23 = vmul.f32 %v1295_v21, %v1292_v35  ;;  %v1298_v8 = vmul.f32 %v1296_v61, %v1293_v26 }
 0x374   : > { %v2670_v1 = vpop.permute.xlu0 %1359  ;;  %v1302_v37 = vpop.permute.xlu1 %1301 }
 0x375   : > { %v1306_v43 = vsel %vm1305_vm5, %v1302_v37, %v2660_v27  ;;  %v1307_v39 = vsel %vm1305_vm5, %v2660_v27, %v1302_v37  ;;  %v1338_v27 = vld [vmem:[#allocation3 + $0x248] sm:$0xff] }
 0x378   : > { %v2672_v9 = vpop.permute.xlu0 %1373  ;;  %v1316_v36 = vpop.permute.xlu1 %1315 }
 0x379   : > { %v1320_v11 = vsel %vm1319_vm6, %v1316_v36, %v1318_v34  ;;  %v1321_v59 = vsel %vm1319_vm6, %v1318_v34, %v1316_v36  ;;  %v1311_v34 = vmul.f32 %v1309_v2, %v1306_v43  ;;  %v1312_v36 = vmul.f32 %v1310_v41, %v1307_v39  ;;  %v1379_v43 = vld [vmem:[#allocation3 + $0x270] sm:$0xff]  ;;  %v1380_v39 = vld [vmem:[#allocation3 + $0x278] sm:$0xff] }
 0x37c   : > { %v2674_v7 = vpop.permute.xlu0 %1387  ;;  %v1330_v47 = vpop.permute.xlu1 %1329 }
 0x37d   : > { %v1334_v37 = vsel %vm1333_vm7, %v1330_v47, %v2666_v22  ;;  %v1335_v57 = vsel %vm1333_vm7, %v2666_v22, %v1330_v47  ;;  %v1325_v22 = vmul.f32 %v1323_v0, %v1320_v11  ;;  %v1326_v47 = vmul.f32 %v1324_v62, %v1321_v59 }
 0x37e   : > { %v1339_v61 = vmul.f32 %v1337_v3, %v1334_v37  ;;  %v1340_v35 = vmul.f32 %v1338_v27, %v1335_v57  ;;  %v1421_v57 = vld [vmem:[#allocation3 + $0x2a0] sm:$0xff] }
 0x37f   : > { %v1327_v11 = vadd.f32 %v1325_v22, %v1271_v33  ;;  %v1328_v59 = vadd.f32 %v1326_v47, %v1272_v18 }
 0x380   : > { %v2676_v51 = vpop.permute.xlu1 %1343  ;;  %v2678_v40 = vpop.permute.xlu0 %1401 }
 0x381   : > { %v1348_v12 = vsel %vm1347_vm8, %v2676_v51, %v2668_v25  ;;  %v1349_v15 = vsel %vm1347_vm8, %v2668_v25, %v2676_v51  ;;  %v1299_v25 = vadd.f32 %v1297_v23, %v2656_v52  ;;  %v1300_v51 = vadd.f32 %v1298_v8, %v2658_v32  ;;  %v1394_v23 = vld [vmem:[#allocation3 + $0x288] sm:$0xff] }
 0x382   : > { %v1353_v2 = vmul.f32 %v1351_v16, %v1348_v12  ;;  %v1354_v41 = vmul.f32 %v1352_v13, %v1349_v15  ;;  %v1422_v16 = vld [vmem:[#allocation3 + $0x2a8] sm:$0xff] }
 0x384   : > { %v2680_v55 = vpop.permute.xlu1 %1357  ;;  %v2682_v4 = vpop.permute.xlu0 %1415 }
 0x385   : > { %v1362_v14 = vsel %vm1361_vm9, %v2680_v55, %v2670_v1  ;;  %v1363_v21 = vsel %vm1361_vm9, %v2670_v1, %v2680_v55  ;;  %v1393_v55 = vld [vmem:[#allocation3 + $0x280] sm:$0xff] }
 0x386   : > { %v1367_v52 = vmul.f32 %v1365_v31, %v1362_v14  ;;  %v1368_v32 = vmul.f32 %v1366_v5, %v1363_v21  ;;  %v1435_v31 = vld [vmem:[#allocation3 + $0x2b0] sm:$0xff]  ;;  %v1436_v5 = vld [vmem:[#allocation3 + $0x2b8] sm:$0xff] }
 0x387   : > { %v1407_v14 = vld [vmem:[#allocation3 + $0x290] sm:$0xff]  ;;  %v1408_v21 = vld [vmem:[#allocation3 + $0x298] sm:$0xff] }
 0x388   : > { %v2684_v24 = vpop.permute.xlu1 %1371  ;;  %v2689_v60 = vpop.permute.xlu0 %1429 }
 0x389   : > { %v1376_v0 = vsel %vm1375_vm10, %v2684_v24, %v2672_v9  ;;  %v1377_v1 = vsel %vm1375_vm10, %v2672_v9, %v2684_v24  ;;  %v1313_v9 = vadd.f32 %v1311_v34, %v2662_v46  ;;  %v1314_v24 = vadd.f32 %v1312_v36, %v2664_v30 }
 0x38a   : > { %v1381_v3 = vmul.f32 %v1379_v43, %v1376_v0  ;;  %v1382_v27 = vmul.f32 %v1380_v39, %v1377_v1  ;;  %v1342_v30 = vadd.f32 %v1340_v35, %v1286_v56  ;;  %v1355_v34 = vadd.f32 %v1353_v2, %v1299_v25  ;;  %v1478_v43 = vld [vmem:[#allocation3 + $0x2e8] sm:$0xff] }
 0x38b   : > { %v1356_v36 = vadd.f32 %v1354_v41, %v1300_v51  ;;  %v1369_v12 = vadd.f32 %v1367_v52, %v1313_v9  ;;  %v1370_v15 = vadd.f32 %v1368_v32, %v1314_v24  ;;  %v1477_v41 = vld [vmem:[#allocation3 + $0x2e0] sm:$0xff]  ;;  %v1450_v32 = vld [vmem:[#allocation3 + $0x2c8] sm:$0xff]  ;;  %v1491_v9 = vld [vmem:[#allocation3 + $0x2f0] sm:$0xff] }
 0x38c   : > { %v2686_v54 = vpop.permute.xlu1 %1385  ;;  %v2703_v50 = vpop.permute.xlu0 %1443  ;;  %v1384_v56 = vadd.f32 %v1382_v27, %v1328_v59  ;;  %v1449_v52 = vld [vmem:[#allocation3 + $0x2c0] sm:$0xff]  ;;  %v1492_v24 = vld [vmem:[#allocation3 + $0x2f8] sm:$0xff] }
 0x38d   : > { %v1390_v8 = vsel %vm1389_vm11, %v2686_v54, %v2674_v7  ;;  %v1391_v62 = vsel %vm1389_vm11, %v2674_v7, %v2686_v54  ;;  %v1341_v54 = vadd.f32 %v1339_v61, %v1285_v10  ;;  %v1383_v10 = vadd.f32 %v1381_v3, %v1327_v11  ;;  %v1463_v11 = vld [vmem:[#allocation3 + $0x2d0] sm:$0xff]  ;;  %v1464_v59 = vld [vmem:[#allocation3 + $0x2d8] sm:$0xff] }
 0x38e   : > { %v1395_v33 = vmul.f32 %v1393_v55, %v1390_v8  ;;  %v1396_v18 = vmul.f32 %v1394_v23, %v1391_v62 }
 0x390   : > { %v2694_v63 = vpop.permute.xlu1 %1399  ;;  %v2745_v17 = vpop.permute.xlu0 %1457  ;;  %v1397_v35 = vadd.f32 %v1395_v33, %v1341_v54  ;;  %v1398_v2 = vadd.f32 %v1396_v18, %v1342_v30 }
 0x391   : > { %v1404_v25 = vsel %vm1403_vm14, %v2694_v63, %v2678_v40  ;;  %v1405_v51 = vsel %vm1403_vm14, %v2678_v40, %v2694_v63 }
 0x392   : > { %v1409_v55 = vmul.f32 %v1407_v14, %v1404_v25  ;;  %v1410_v23 = vmul.f32 %v1408_v21, %v1405_v51 }
 0x394   : > { %v2705_v38 = vpop.permute.xlu1 %1413  ;;  %v1472_v37 = vpop.permute.xlu0 %1471 }
 0x395   : > { %v1418_v13 = vsel %vm1417_vm12, %v2705_v38, %v2682_v4  ;;  %v1419_v7 = vsel %vm1417_vm12, %v2682_v4, %v2705_v38 }
 0x396   : > { %v1423_v22 = vmul.f32 %v1421_v57, %v1418_v13  ;;  %v1424_v47 = vmul.f32 %v1422_v16, %v1419_v7 }
 0x398   : > { %v2726_v6 = vpop.permute.xlu1 %1427  ;;  %v1486_v39 = vpop.permute.xlu0 %1485  ;;  %v1425_v8 = vadd.f32 %v1423_v22, %v1369_v12  ;;  %v1426_v62 = vadd.f32 %v1424_v47, %v1370_v15  ;;  %v1411_v12 = vadd.f32 %v1409_v55, %v1355_v34  ;;  %v1412_v15 = vadd.f32 %v1410_v23, %v1356_v36 }
 0x399   : > { %v1432_v4 = vsel %vm1431_vm13, %v2726_v6, %v2689_v60  ;;  %v1433_v38 = vsel %vm1431_vm13, %v2689_v60, %v2726_v6 }
 0x39a   : > { %v1437_v0 = vmul.f32 %v1435_v31, %v1432_v4  ;;  %v1438_v1 = vmul.f32 %v1436_v5, %v1433_v38 }
 0x39c   : > { %v1442_v26 = vpop.permute.xlu1 %1441  ;;  %v1439_v54 = vadd.f32 %v1437_v0, %v1383_v10  ;;  %v1440_v30 = vadd.f32 %v1438_v1, %v1384_v56  ;;  %v1500_v31 = vpop.permute.xlu0 %1499 }
 0x39d   : > { %v1446_v40 = vsel %vm1445_vm0, %v1442_v26, %v2703_v50  ;;  %v1447_v63 = vsel %vm1445_vm0, %v2703_v50, %v1442_v26 }
 0x39e   : > { %v1451_v50 = vmul.f32 %v1449_v52, %v1446_v40  ;;  %v1452_v26 = vmul.f32 %v1450_v32, %v1447_v63 }
 0x3a0   : > { %v1456_v46 = vpop.permute.xlu1 %1455  ;;  %v1453_v25 = vadd.f32 %v1451_v50, %v1397_v35  ;;  %v1454_v51 = vadd.f32 %v1452_v26, %v1398_v2 }
 0x3a1   : > { %v1460_v3 = vsel %vm1459_vm1, %v1456_v46, %v2745_v17  ;;  %v1461_v27 = vsel %vm1459_vm1, %v2745_v17, %v1456_v46  ;;  %v1505_v17 = vld [vmem:[#allocation3 + $0x300] sm:$0xff]  ;;  %v1506_v46 = vld [vmem:[#allocation3 + $0x308] sm:$0xff] }
 0x3a2   : > { %v1465_v22 = vmul.f32 %v1463_v11, %v1460_v3  ;;  %v1466_v47 = vmul.f32 %v1464_v59, %v1461_v27  ;;  %v1554_v59 = vsub.s32 1, %v2320_v19  ;;  %v1570_v3 = vsub.s32 2, %v2320_v19 }
 0x3a3   : > { %v1586_v27 = vsub.s32 3, %v2320_v19 }
 0x3a4   : > { %v1470_v61 = vpop.permute.xlu1 %1469 }
 0x3a5   : > { %v1474_v60 = vsel %vm1473_vm15, %v1470_v61, %v1472_v37  ;;  %v1475_v6 = vsel %vm1473_vm15, %v1472_v37, %v1470_v61 }
 0x3a6   : > { %v1479_v37 = vmul.f32 %v1477_v41, %v1474_v60  ;;  %v1480_v57 = vmul.f32 %v1478_v43, %v1475_v6  ;;  %v1467_v43 = vadd.f32 %v1465_v22, %v1411_v12  ;;  %v1468_v60 = vadd.f32 %v1466_v47, %v1412_v15 }
 0x3a8   : > { %v1484_v16 = vpop.permute.xlu1 %1483  ;;  %v1481_v5 = vadd.f32 %v1479_v37, %v1425_v8  ;;  %v1482_v4 = vadd.f32 %v1480_v57, %v1426_v62 }
 0x3a9   : > { %v1488_v13 = vsel %vm1487_vm2, %v1484_v16, %v1486_v39  ;;  %v1489_v7 = vsel %vm1487_vm2, %v1486_v39, %v1484_v16 }
 0x3aa   : > { %v1493_v33 = vmul.f32 %v1491_v9, %v1488_v13  ;;  %v1494_v18 = vmul.f32 %v1492_v24, %v1489_v7 }
 0x3ac   : > { %v1495_v38 = vadd.f32 %v1493_v33, %v1439_v54  ;;  %v1496_v14 = vadd.f32 %v1494_v18, %v1440_v30  ;;  %v1498_v21 = vpop.permute.xlu1 %1497 }
 0x3ad   : > { %v1502_v10 = vsel %vm1501_vm3, %v1498_v21, %v1500_v31  ;;  %v1503_v56 = vsel %vm1501_vm3, %v1500_v31, %v1498_v21 }
 0x3ae   : > { %v1513_v34 = vadd.f32 %v1495_v38, %v1481_v5  ;;  %v1514_v36 = vadd.f32 %v1496_v14, %v1482_v4  ;;  %v1507_v61 = vmul.f32 %v1505_v17, %v1502_v10  ;;  %v1508_v41 = vmul.f32 %v1506_v46, %v1503_v56 }
 0x3b0   : > { %v1509_v6 = vadd.f32 %v1507_v61, %v1453_v25  ;;  %v1510_v39 = vadd.f32 %v1508_v41, %v1454_v51 }
 0x3b2   : > { %v1511_v0 = vadd.f32 %v1509_v6, %v1467_v43  ;;  %v1512_v1 = vadd.f32 %v1510_v39, %v1468_v60 }
 0x3b4   : > { %v1515_v52 = vadd.f32 %v1513_v34, %v1511_v0  ;;  %v1516_v32 = vadd.f32 %v1514_v36, %v1512_v1 }
 0x3b6   : > { %v1519_v35 = vrot.slane %v1515_v52, 4  ;;  %v1520_v2 = vrot.slane %v1516_v32, 4 }
 0x3b8   : > { %v1523_v40 = vadd.f32 %v1519_v35, %v1515_v52  ;;  %v1524_v63 = vadd.f32 %v1520_v2, %v1516_v32 }
 0x3ba   : > { %v1525_v55 = vsub.f32 0.0, %v1523_v40  ;;  %v1526_v23 = vsub.f32 0.0, %v1524_v63 }
 0x3bc   : > { %v1527_v42 = vmul.f32 1.442695, %v1525_v55  ;;  %v1529_v8 = vmul.f32 1.442695, %v1526_v23 }
 0x3be   : > { %1863 = vpow2.f32 %v1527_v42 }
 0x3bf   : > { %1865 = vpow2.f32 %v1529_v8 }
 0x3c8   : > { %v1864_v62 = vpop.eup %1863 }
 0x3c9   : > { %v1866_v9 = vpop.eup %1865  ;;  %v1531_v24 = vadd.f32 1.0, %v1864_v62 }
 0x3ca   : > { %v1532_v11 = vadd.f32 1.0, %v1866_v9 }
 0x3cb   : > { %1867 = vrcp.f32 %v1531_v24 }
 0x3cc   : > { %1869 = vrcp.f32 %v1532_v11 }
 0x3d5   : > { %v1868_v37 = vpop.eup %1867 }
 0x3d6   : > { %v1870_v57 = vpop.eup %1869  ;;  %v1540_v16 = vrot.slane %v1868_v37, %v2326_v29  ;;  %v1555_v50 = vrot.slane %v1868_v37, %v1554_v59  ;;  %v1571_v26 = vrot.slane %v1868_v37, %v1570_v3  ;;  %v1587_v13 = vrot.slane %v1868_v37, %v1586_v27 }
 0x3d7   : > { %v1544_v7 = vrot.slane %v1870_v57, %v2326_v29  ;;  %v1559_v54 = vrot.slane %v1870_v57, %v1554_v59  ;;  %v1575_v30 = vrot.slane %v1870_v57, %v1570_v3  ;;  %v1591_v33 = vrot.slane %v1870_v57, %v1586_v27 }
 0x3d8   : > { %v1545_v18 = vmul.f32 %v1540_v16, %v2348_v48  ;;  %v1560_v19 = vmul.f32 %v1555_v50, %v2339_v44  ;;  %v1576_v12 = vmul.f32 %v1571_v26, %v2375_v53  ;;  %v1592_v15 = vmul.f32 %v1587_v13, %v2396_v20 }
 0x3d9   : > { %v1546_v22 = vmul.f32 %v1544_v7, %v2351_v49  ;;  %v1561_v29 = vmul.f32 %v1559_v54, %v2342_v45  ;;  %v1577_v47 = vmul.f32 %v1575_v30, %v2379_v58  ;;  %v1593_v17 = vmul.f32 %v1591_v33, %v2403_v28 }
 0x3db   : > { %v1549_v44 = vcombine.low %v1545_v18, %v1546_v22  ;;  %v1564_v48 = vcombine.low %v1560_v19, %v1561_v29  ;;  %v1580_v49 = vcombine.low %v1576_v12, %v1577_v47  ;;  %v1596_v53 = vcombine.low %v1592_v15, %v1593_v17 }
 0x3dd   : > { %1551 = vst [vmem:[%s312_s16] sm:$0xff] %v1549_v44  ;;  %1715 = vst [vmem:[%s312_s16 + $0x8] sm:$0xff] %v1564_v48 }
 0x3de   : > { %1716 = vst [vmem:[%s312_s16 + $0x10] sm:$0xff] %v1580_v49  ;;  %1717 = vst [vmem:[%s312_s16 + $0x18] sm:$0xff] %v1596_v53 }
 0x3df   : > { %1942 = shalt.err (!%p1939_p7)
}
 0x3e0   : > { %s1943_s21 = scalar_lea.hbm %s2847_s9, 512  ;;  %s1947_s20 = scalar_lea.hbm %s2900_s7, 1024 }
 0x3e1   : > { %p1944_p9 = scmp.ne.s32.totalorder %s2847_s9, %s1943_s21  ;;  %p1948_p5 = scmp.lt.u32.totalorder %s2847_s9, %s2900_s7 }
 0x3e2   : > { %p1949_p1 = scmp.lt.u32.totalorder %s1947_s20, %s1943_s21  ;;  %p1951_p4 = scmp.lt.u32.totalorder %s1943_s21, %s2847_s9 }
 0x3e3   : > { %p1945_p2 = pnand %p1944_p9, %p2191_p12 }
 0x3e4   : > { %p1950_p11 = por %p1949_p1, %p1948_p5 }
 0x3e5   : > { %p1946_p0 = pneg %p1945_p2 }
 0x3e6   : > { %p1952_p6 = por %p1951_p4, %p1950_p11 }
 0x3e8   : > { %p1953_p8 = pnand %p1952_p6, %p1946_p0 }
 0x3ea   : > { %1956 = shalt.err (!%p1953_p8)
}
 0x3eb   : > { %s2058_s23 = smov 128   ;;  %s2059_s15 = smov 8  }
 0x3ec   : > { %1734 = dma.vmem_to_hbm [thread:$0]  (%p2191_p12), %s2849_s30, 512, %s2847_s9, %s1601_s14, %s2058_s23, %s2058_s23, %s2059_s15  }
 0x3ed PF: > { %s1630_s29 = sand.u32 1, %s1987_s24   ;;  %p2917_p10 = scmp.ne.s32.totalorder %s2905_s8, 0 }
 0x3ee   : > { %p2918_p13 = scmp.ge.s32.totalorder %s1999_s27, 2  ;;  %s1631_s11 = scalar_lea.sflag [#allocation5], %s1630_s29 }
 0x3f0   : > { %p1745_p3 = pnand %p2918_p13, %p2917_p10 }
 0x3f2   : > { %1982 = dma.done.wait (!%p1745_p3), %s1631_s11, 512  }
 0x3f3   : > { %1984 = vsyncadd (!%p1745_p3), %s1631_s11, 4294966784  ;;  %p21_p7 = scmp.ge.s32.totalorder %s2156_s13, 4   ;;  %s2919_s24 = smov %s1991_s25 }
 0x3f4   : > { %s2920_s25 = smov %s1995_s26  ;;  %s2921_s26 = smov %s2187_s18 }
 0x3f5   : > { %s2922_s27 = smov %s2156_s13  ;;  %23 = sbr.rel (!%p21_p7) target bundleno = 6 (0x6), region = 159 }
 0x3fc   :  { %1636 = vsyncpa [#allocation4], 1 }
 0x3fd   :  { %1638 = vsyncpa [#allocation4 + $0x1], 1 }
 0x3fe   :  { %1639 = vsyncpa [#allocation7], 1 }
 0x3ff   :  { %1641 = vsyncpa [#allocation7 + $0x1], 1 }
 0x400   :  { %1642 = vsyncpa [#allocation5], 1 }
 0x401   :  { %1644 = vsyncpa [#allocation5 + $0x1], 1 }

</bundles_post_ra>
